<compile_context>
chip_gen: v6e
topology: v6e:2x2x1
jax: 0.10.0
libtpu: 0.0.40
codegen_flags: <defaults>
</compile_context>

<pallas_src>
import numpy as np
import jax
import jax.numpy as jnp
from jax import lax
from jax.experimental import pallas as pl
from jax.experimental.pallas import tpu as pltpu

# ----- model hyper-params (small, consistent with a time-series denoiser) ----
B, S, D = 2, 8, 32          # batch, sequence length, d_model
H = 4                       # num heads
DH = D // H                 # head dim
DFF = 64                    # feed-forward hidden dim
NUM_LAYERS = 2
EPS = 1e-5
N = B * S                   # folded rows
SCALE = 1.0 / float(np.sqrt(DH))


def _layer_norm(x, gamma, beta):
    mean = jnp.mean(x, axis=-1, keepdims=True)
    var = jnp.mean((x - mean) ** 2, axis=-1, keepdims=True)
    return (x - mean) / jnp.sqrt(var + EPS) * gamma + beta


def encoder_kernel(x_ref, mask_ref,
                   wqkv_ref, bqkv_ref, wo_ref, bo_ref,
                   w1_ref, b1_ref, w2_ref, b2_ref,
                   g1_ref, be1_ref, g2_ref, be2_ref,
                   out_ref):
    # Load everything once (single kernel invocation, weights shared by layers).
    src = x_ref[...]          # (N, D)   N = B*S
    mask = mask_ref[...]      # (N, N) additive bias: 0 same-batch, -1e30 cross
    wqkv = wqkv_ref[...]      # (D, 3D)
    bqkv = bqkv_ref[...]      # (1, 3D)
    wo = wo_ref[...]          # (D, D)
    bo = bo_ref[...]          # (1, D)
    w1 = w1_ref[...]          # (D, DFF)
    b1 = b1_ref[...]          # (1, DFF)
    w2 = w2_ref[...]          # (DFF, D)
    b2 = b2_ref[...]          # (1, D)
    g1 = g1_ref[...]; be1 = be1_ref[...]
    g2 = g2_ref[...]; be2 = be2_ref[...]

    # Statically unrolled shared-weight layer stack (no layer grid axis).
    for _ in range(NUM_LAYERS):
        # ---- fused QKV projection: one (N,D) x (D,3D) matmul ----
        qkv = jnp.dot(src, wqkv, preferred_element_type=jnp.float32) + bqkv

        # ---- multi-head self-attention, heads accumulated into Wo directly --
        attn = jnp.zeros((N, D), jnp.float32)
        for h in range(H):
            qh = qkv[:, h * DH:(h + 1) * DH]                 # (N, DH)
            kh = qkv[:, D + h * DH:D + (h + 1) * DH]         # (N, DH)
            vh = qkv[:, 2 * D + h * DH:2 * D + (h + 1) * DH]  # (N, DH)

            # q @ k^T via dot_general contracting dim 1 of both (no vxpose).
            s = lax.dot_general(qh, kh, (((1,), (1,)), ((), ())),
                                preferred_element_type=jnp.float32) * SCALE
            s = s + mask                                     # block-diag batches
            s = s - jnp.max(s, axis=-1, keepdims=True)
            e = jnp.exp(s)
            p = e * pl.reciprocal(jnp.sum(e, axis=-1, keepdims=True),
                                  approx=True)
            oh = jnp.dot(p, vh, preferred_element_type=jnp.float32)  # (N, DH)
            # fold head-concat into the output projection
            attn = attn + jnp.dot(oh, wo[h * DH:(h + 1) * DH, :],
                                  preferred_element_type=jnp.float32)
        attn = attn + bo

        # residual + norm1 (dropout identity in eval)
        x1 = _layer_norm(src + attn, g1, be1)

        # ---- feed-forward ----
        hidden = jnp.maximum(
            jnp.dot(x1, w1, preferred_element_type=jnp.float32) + b1, 0.0)
        ff = jnp.dot(hidden, w2, preferred_element_type=jnp.float32) + b2

        src = _layer_norm(x1 + ff, g2, be2)

    out_ref[...] = src


def run_encoder(x, params):
    (wq, wk, wv, bq, bk, bv, wo, bo,
     w1, b1, w2, b2, g1, be1, g2, be2) = params

    # Fuse QKV weights/biases in the wrapper (free XLA concat).
    wqkv = jnp.concatenate([wq, wk, wv], axis=1)     # (D, 3D)
    bqkv = jnp.concatenate([bq, bk, bv], axis=1)     # (1, 3D)

    # Fold batch into M dim; per-batch attention kept via additive mask bias.
    x2d = x.reshape(N, D)
    batch_ids = jnp.arange(N, dtype=jnp.int32) // S
    mask_bias = jnp.where(batch_ids[:, None] == batch_ids[None, :],
                          0.0, -1e30).astype(jnp.float32)

    inputs = (x2d, mask_bias, wqkv, bqkv, wo, bo,
              w1, b1, w2, b2, g1, be1, g2, be2)

    vmem = pl.BlockSpec(memory_space=pltpu.MemorySpace.VMEM)
    out2d = pl.pallas_call(
        encoder_kernel,
        out_shape=jax.ShapeDtypeStruct((N, D), jnp.float32),
        in_specs=[vmem] * len(inputs),
        out_specs=vmem,
    )(*inputs)
    return out2d.reshape(B, S, D)


# ---------------- pure-JAX reference (for correctness check) ----------------
def _ref_layer(src, p):
    (wq, wk, wv, bq, bk, bv, wo, bo, w1, b1, w2, b2, g1, be1, g2, be2) = p
    q = src @ wq + bq
    k = src @ wk + bk
    v = src @ wv + bv

    def split(t):  # (B,S,D) -> (B,H,S,DH)
        return t.reshape(B, S, H, DH).transpose(0, 2, 1, 3)

    qh, kh, vh = split(q), split(k), split(v)
    scores = jnp.einsum('bhqd,bhkd->bhqk', qh, kh) / jnp.sqrt(jnp.float32(DH))
    p_attn = jax.nn.softmax(scores, axis=-1)
    o = jnp.einsum('bhqk,bhkd->bhqd', p_attn, vh)
    o = o.transpose(0, 2, 1, 3).reshape(B, S, D)
    o = o @ wo + bo

    x1 = _layer_norm(src + o, g1, be1)
    ff = jnp.maximum(x1 @ w1 + b1, 0.0) @ w2 + b2
    return _layer_norm(x1 + ff, g2, be2)


def ref_forward(x, params):
    out = x
    for _ in range(NUM_LAYERS):   # same (shared) layer applied num_layers times
        out = _ref_layer(out, params)
    return out


if __name__ == "__main__":
    key = jax.random.PRNGKey(0)
    ks = jax.random.split(key, 12)

    def init(k, shape, scl=0.05):
        return jax.random.normal(k, shape, jnp.float32) * scl

    params = (
        init(ks[0], (D, D)),          # wq
        init(ks[1], (D, D)),          # wk
        init(ks[2], (D, D)),          # wv
        init(ks[3], (1, D), 0.02),    # bq
        init(ks[4], (1, D), 0.02),    # bk
        init(ks[5], (1, D), 0.02),    # bv
        init(ks[6], (D, D)),          # wo
        init(ks[7], (1, D), 0.02),    # bo
        init(ks[8], (D, DFF)),        # w1
        init(ks[9], (1, DFF), 0.02),  # b1
        init(ks[10], (DFF, D)),       # w2
        jnp.zeros((1, D), jnp.float32),   # b2
        jnp.ones((1, D), jnp.float32),    # ln1 gamma
        jnp.zeros((1, D), jnp.float32),   # ln1 beta
        jnp.ones((1, D), jnp.float32),    # ln2 gamma
        jnp.zeros((1, D), jnp.float32),   # ln2 beta
    )

    x = jax.random.normal(ks[11], (B, S, D), jnp.float32)

    out = jax.block_until_ready(run_encoder(x, params))
    ref = jax.block_until_ready(ref_forward(x, params))

    assert out.shape == (B, S, D)
    assert np.allclose(np.asarray(out), np.asarray(ref),
                       rtol=2e-3, atol=2e-3), \
        "Pallas output mismatch vs JAX reference"

    print("KERNEL_OK")
</pallas_src>

<mosaic_0001>
module attributes {stable_mosaic.version = 11 : i64} {
  func.func @encoder_kernel(%arg0: memref<16x32xf32, #tpu.memory_space<vmem>>, %arg1: memref<16x16xf32, #tpu.memory_space<vmem>>, %arg2: memref<32x96xf32, #tpu.memory_space<vmem>>, %arg3: memref<1x96xf32, #tpu.memory_space<vmem>>, %arg4: memref<32x32xf32, #tpu.memory_space<vmem>>, %arg5: memref<1x32xf32, #tpu.memory_space<vmem>>, %arg6: memref<32x64xf32, #tpu.memory_space<vmem>>, %arg7: memref<1x64xf32, #tpu.memory_space<vmem>>, %arg8: memref<64x32xf32, #tpu.memory_space<vmem>>, %arg9: memref<1x32xf32, #tpu.memory_space<vmem>>, %arg10: memref<1x32xf32, #tpu.memory_space<vmem>>, %arg11: memref<1x32xf32, #tpu.memory_space<vmem>>, %arg12: memref<1x32xf32, #tpu.memory_space<vmem>>, %arg13: memref<1x32xf32, #tpu.memory_space<vmem>>, %arg14: memref<16x32xf32, #tpu.memory_space<vmem>>) attributes {dimension_semantics = [], scalar_prefetch = 0 : i64, scratch_operands = 0 : i64, tpu.core_type = #tpu.core_type<tc>} {
    %c0 = arith.constant 0 : index
    %c0_0 = arith.constant 0 : index
    %0 = vector.load %arg0[%c0, %c0_0] : memref<16x32xf32, #tpu.memory_space<vmem>>, vector<16x32xf32>
    %c0_1 = arith.constant 0 : index
    %c0_2 = arith.constant 0 : index
    %1 = vector.load %arg1[%c0_1, %c0_2] : memref<16x16xf32, #tpu.memory_space<vmem>>, vector<16x16xf32>
    %c0_3 = arith.constant 0 : index
    %c0_4 = arith.constant 0 : index
    %2 = vector.load %arg2[%c0_3, %c0_4] : memref<32x96xf32, #tpu.memory_space<vmem>>, vector<32x96xf32>
    %c0_5 = arith.constant 0 : index
    %c0_6 = arith.constant 0 : index
    %3 = vector.load %arg3[%c0_5, %c0_6] : memref<1x96xf32, #tpu.memory_space<vmem>>, vector<1x96xf32>
    %c0_7 = arith.constant 0 : index
    %c0_8 = arith.constant 0 : index
    %4 = vector.load %arg4[%c0_7, %c0_8] : memref<32x32xf32, #tpu.memory_space<vmem>>, vector<32x32xf32>
    %c0_9 = arith.constant 0 : index
    %c0_10 = arith.constant 0 : index
    %5 = vector.load %arg5[%c0_9, %c0_10] : memref<1x32xf32, #tpu.memory_space<vmem>>, vector<1x32xf32>
    %c0_11 = arith.constant 0 : index
    %c0_12 = arith.constant 0 : index
    %6 = vector.load %arg6[%c0_11, %c0_12] : memref<32x64xf32, #tpu.memory_space<vmem>>, vector<32x64xf32>
    %c0_13 = arith.constant 0 : index
    %c0_14 = arith.constant 0 : index
    %7 = vector.load %arg7[%c0_13, %c0_14] : memref<1x64xf32, #tpu.memory_space<vmem>>, vector<1x64xf32>
    %c0_15 = arith.constant 0 : index
    %c0_16 = arith.constant 0 : index
    %8 = vector.load %arg8[%c0_15, %c0_16] : memref<64x32xf32, #tpu.memory_space<vmem>>, vector<64x32xf32>
    %c0_17 = arith.constant 0 : index
    %c0_18 = arith.constant 0 : index
    %9 = vector.load %arg9[%c0_17, %c0_18] : memref<1x32xf32, #tpu.memory_space<vmem>>, vector<1x32xf32>
    %c0_19 = arith.constant 0 : index
    %c0_20 = arith.constant 0 : index
    %10 = vector.load %arg10[%c0_19, %c0_20] : memref<1x32xf32, #tpu.memory_space<vmem>>, vector<1x32xf32>
    %c0_21 = arith.constant 0 : index
    %c0_22 = arith.constant 0 : index
    %11 = vector.load %arg11[%c0_21, %c0_22] : memref<1x32xf32, #tpu.memory_space<vmem>>, vector<1x32xf32>
    %c0_23 = arith.constant 0 : index
    %c0_24 = arith.constant 0 : index
    %12 = vector.load %arg12[%c0_23, %c0_24] : memref<1x32xf32, #tpu.memory_space<vmem>>, vector<1x32xf32>
    %c0_25 = arith.constant 0 : index
    %c0_26 = arith.constant 0 : index
    %13 = vector.load %arg13[%c0_25, %c0_26] : memref<1x32xf32, #tpu.memory_space<vmem>>, vector<1x32xf32>
    %cst = arith.constant dense<0.000000e+00> : vector<16x96xf32>
    %14 = tpu.matmul %0, %2, %cst {dimension_numbers = #tpu.dot_dimension_numbers<[1], [0], [0], [1], [0, 0, 1, 1], [], []>} : vector<16x32xf32>, vector<32x96xf32>, vector<16x96xf32> -> vector<16x96xf32>
    %15 = vector.broadcast %3 : vector<1x96xf32> to vector<16x96xf32>
    %16 = arith.addf %14, %15 : vector<16x96xf32>
    %cst_27 = arith.constant 0.000000e+00 : f32
    %17 = vector.broadcast %cst_27 : f32 to vector<16x32xf32>
    %18 = vector.extract_strided_slice %16 {offsets = [0, 0], sizes = [16, 8], strides = [1, 1]} : vector<16x96xf32> to vector<16x8xf32>
    %19 = vector.extract_strided_slice %16 {offsets = [0, 32], sizes = [16, 8], strides = [1, 1]} : vector<16x96xf32> to vector<16x8xf32>
    %20 = vector.extract_strided_slice %16 {offsets = [0, 64], sizes = [16, 8], strides = [1, 1]} : vector<16x96xf32> to vector<16x8xf32>
    %cst_28 = arith.constant dense<0.000000e+00> : vector<16x16xf32>
    %21 = tpu.matmul %18, %19, %cst_28 {dimension_numbers = #tpu.dot_dimension_numbers<[1], [1], [0], [0], [0, 0, 1, 0], [], []>} : vector<16x8xf32>, vector<16x8xf32>, vector<16x16xf32> -> vector<16x16xf32>
    %cst_29 = arith.constant 0.353553385 : f32
    %22 = vector.broadcast %cst_29 : f32 to vector<16x16xf32>
    %23 = arith.mulf %21, %22 : vector<16x16xf32>
    %24 = arith.addf %23, %1 : vector<16x16xf32>
    %cst_30 = arith.constant dense<0xFF800000> : vector<16xf32>
    %25 = vector.multi_reduction <maximumf>, %24, %cst_30 [1] : vector<16x16xf32> to vector<16xf32>
    %26 = vector.shape_cast %25 : vector<16xf32> to vector<16x1xf32>
    %27 = vector.broadcast %26 : vector<16x1xf32> to vector<16x16xf32>
    %28 = arith.subf %24, %27 : vector<16x16xf32>
    %29 = math.exp %28 : vector<16x16xf32>
    %cst_31 = arith.constant dense<0.000000e+00> : vector<16xf32>
    %30 = vector.multi_reduction <add>, %29, %cst_31 [1] : vector<16x16xf32> to vector<16xf32>
    %31 = vector.shape_cast %30 : vector<16xf32> to vector<16x1xf32>
    %32 = tpu.reciprocal %31 {approx = true} : vector<16x1xf32> -> vector<16x1xf32>
    %33 = vector.broadcast %32 : vector<16x1xf32> to vector<16x16xf32>
    %34 = arith.mulf %29, %33 : vector<16x16xf32>
    %cst_32 = arith.constant dense<0.000000e+00> : vector<16x8xf32>
    %35 = tpu.matmul %34, %20, %cst_32 {dimension_numbers = #tpu.dot_dimension_numbers<[1], [0], [0], [1], [0, 0, 1, 1], [], []>} : vector<16x16xf32>, vector<16x8xf32>, vector<16x8xf32> -> vector<16x8xf32>
    %36 = vector.extract_strided_slice %4 {offsets = [0, 0], sizes = [8, 32], strides = [1, 1]} : vector<32x32xf32> to vector<8x32xf32>
    %cst_33 = arith.constant dense<0.000000e+00> : vector<16x32xf32>
    %37 = tpu.matmul %35, %36, %cst_33 {dimension_numbers = #tpu.dot_dimension_numbers<[1], [0], [0], [1], [0, 0, 1, 1], [], []>} : vector<16x8xf32>, vector<8x32xf32>, vector<16x32xf32> -> vector<16x32xf32>
    %38 = arith.addf %17, %37 : vector<16x32xf32>
    %39 = vector.extract_strided_slice %16 {offsets = [0, 8], sizes = [16, 8], strides = [1, 1]} : vector<16x96xf32> to vector<16x8xf32>
    %40 = vector.extract_strided_slice %16 {offsets = [0, 40], sizes = [16, 8], strides = [1, 1]} : vector<16x96xf32> to vector<16x8xf32>
    %41 = vector.extract_strided_slice %16 {offsets = [0, 72], sizes = [16, 8], strides = [1, 1]} : vector<16x96xf32> to vector<16x8xf32>
    %cst_34 = arith.constant dense<0.000000e+00> : vector<16x16xf32>
    %42 = tpu.matmul %39, %40, %cst_34 {dimension_numbers = #tpu.dot_dimension_numbers<[1], [1], [0], [0], [0, 0, 1, 0], [], []>} : vector<16x8xf32>, vector<16x8xf32>, vector<16x16xf32> -> vector<16x16xf32>
    %cst_35 = arith.constant 0.353553385 : f32
    %43 = vector.broadcast %cst_35 : f32 to vector<16x16xf32>
    %44 = arith.mulf %42, %43 : vector<16x16xf32>
    %45 = arith.addf %44, %1 : vector<16x16xf32>
    %cst_36 = arith.constant dense<0xFF800000> : vector<16xf32>
    %46 = vector.multi_reduction <maximumf>, %45, %cst_36 [1] : vector<16x16xf32> to vector<16xf32>
    %47 = vector.shape_cast %46 : vector<16xf32> to vector<16x1xf32>
    %48 = vector.broadcast %47 : vector<16x1xf32> to vector<16x16xf32>
    %49 = arith.subf %45, %48 : vector<16x16xf32>
    %50 = math.exp %49 : vector<16x16xf32>
    %cst_37 = arith.constant dense<0.000000e+00> : vector<16xf32>
    %51 = vector.multi_reduction <add>, %50, %cst_37 [1] : vector<16x16xf32> to vector<16xf32>
    %52 = vector.shape_cast %51 : vector<16xf32> to vector<16x1xf32>
    %53 = tpu.reciprocal %52 {approx = true} : vector<16x1xf32> -> vector<16x1xf32>
    %54 = vector.broadcast %53 : vector<16x1xf32> to vector<16x16xf32>
    %55 = arith.mulf %50, %54 : vector<16x16xf32>
    %cst_38 = arith.constant dense<0.000000e+00> : vector<16x8xf32>
    %56 = tpu.matmul %55, %41, %cst_38 {dimension_numbers = #tpu.dot_dimension_numbers<[1], [0], [0], [1], [0, 0, 1, 1], [], []>} : vector<16x16xf32>, vector<16x8xf32>, vector<16x8xf32> -> vector<16x8xf32>
    %57 = vector.extract_strided_slice %4 {offsets = [8, 0], sizes = [8, 32], strides = [1, 1]} : vector<32x32xf32> to vector<8x32xf32>
    %cst_39 = arith.constant dense<0.000000e+00> : vector<16x32xf32>
    %58 = tpu.matmul %56, %57, %cst_39 {dimension_numbers = #tpu.dot_dimension_numbers<[1], [0], [0], [1], [0, 0, 1, 1], [], []>} : vector<16x8xf32>, vector<8x32xf32>, vector<16x32xf32> -> vector<16x32xf32>
    %59 = arith.addf %38, %58 : vector<16x32xf32>
    %60 = vector.extract_strided_slice %16 {offsets = [0, 16], sizes = [16, 8], strides = [1, 1]} : vector<16x96xf32> to vector<16x8xf32>
    %61 = vector.extract_strided_slice %16 {offsets = [0, 48], sizes = [16, 8], strides = [1, 1]} : vector<16x96xf32> to vector<16x8xf32>
    %62 = vector.extract_strided_slice %16 {offsets = [0, 80], sizes = [16, 8], strides = [1, 1]} : vector<16x96xf32> to vector<16x8xf32>
    %cst_40 = arith.constant dense<0.000000e+00> : vector<16x16xf32>
    %63 = tpu.matmul %60, %61, %cst_40 {dimension_numbers = #tpu.dot_dimension_numbers<[1], [1], [0], [0], [0, 0, 1, 0], [], []>} : vector<16x8xf32>, vector<16x8xf32>, vector<16x16xf32> -> vector<16x16xf32>
    %cst_41 = arith.constant 0.353553385 : f32
    %64 = vector.broadcast %cst_41 : f32 to vector<16x16xf32>
    %65 = arith.mulf %63, %64 : vector<16x16xf32>
    %66 = arith.addf %65, %1 : vector<16x16xf32>
    %cst_42 = arith.constant dense<0xFF800000> : vector<16xf32>
    %67 = vector.multi_reduction <maximumf>, %66, %cst_42 [1] : vector<16x16xf32> to vector<16xf32>
    %68 = vector.shape_cast %67 : vector<16xf32> to vector<16x1xf32>
    %69 = vector.broadcast %68 : vector<16x1xf32> to vector<16x16xf32>
    %70 = arith.subf %66, %69 : vector<16x16xf32>
    %71 = math.exp %70 : vector<16x16xf32>
    %cst_43 = arith.constant dense<0.000000e+00> : vector<16xf32>
    %72 = vector.multi_reduction <add>, %71, %cst_43 [1] : vector<16x16xf32> to vector<16xf32>
    %73 = vector.shape_cast %72 : vector<16xf32> to vector<16x1xf32>
    %74 = tpu.reciprocal %73 {approx = true} : vector<16x1xf32> -> vector<16x1xf32>
    %75 = vector.broadcast %74 : vector<16x1xf32> to vector<16x16xf32>
    %76 = arith.mulf %71, %75 : vector<16x16xf32>
    %cst_44 = arith.constant dense<0.000000e+00> : vector<16x8xf32>
    %77 = tpu.matmul %76, %62, %cst_44 {dimension_numbers = #tpu.dot_dimension_numbers<[1], [0], [0], [1], [0, 0, 1, 1], [], []>} : vector<16x16xf32>, vector<16x8xf32>, vector<16x8xf32> -> vector<16x8xf32>
    %78 = vector.extract_strided_slice %4 {offsets = [16, 0], sizes = [8, 32], strides = [1, 1]} : vector<32x32xf32> to vector<8x32xf32>
    %cst_45 = arith.constant dense<0.000000e+00> : vector<16x32xf32>
    %79 = tpu.matmul %77, %78, %cst_45 {dimension_numbers = #tpu.dot_dimension_numbers<[1], [0], [0], [1], [0, 0, 1, 1], [], []>} : vector<16x8xf32>, vector<8x32xf32>, vector<16x32xf32> -> vector<16x32xf32>
    %80 = arith.addf %59, %79 : vector<16x32xf32>
    %81 = vector.extract_strided_slice %16 {offsets = [0, 24], sizes = [16, 8], strides = [1, 1]} : vector<16x96xf32> to vector<16x8xf32>
    %82 = vector.extract_strided_slice %16 {offsets = [0, 56], sizes = [16, 8], strides = [1, 1]} : vector<16x96xf32> to vector<16x8xf32>
    %83 = vector.extract_strided_slice %16 {offsets = [0, 88], sizes = [16, 8], strides = [1, 1]} : vector<16x96xf32> to vector<16x8xf32>
    %cst_46 = arith.constant dense<0.000000e+00> : vector<16x16xf32>
    %84 = tpu.matmul %81, %82, %cst_46 {dimension_numbers = #tpu.dot_dimension_numbers<[1], [1], [0], [0], [0, 0, 1, 0], [], []>} : vector<16x8xf32>, vector<16x8xf32>, vector<16x16xf32> -> vector<16x16xf32>
    %cst_47 = arith.constant 0.353553385 : f32
    %85 = vector.broadcast %cst_47 : f32 to vector<16x16xf32>
    %86 = arith.mulf %84, %85 : vector<16x16xf32>
    %87 = arith.addf %86, %1 : vector<16x16xf32>
    %cst_48 = arith.constant dense<0xFF800000> : vector<16xf32>
    %88 = vector.multi_reduction <maximumf>, %87, %cst_48 [1] : vector<16x16xf32> to vector<16xf32>
    %89 = vector.shape_cast %88 : vector<16xf32> to vector<16x1xf32>
    %90 = vector.broadcast %89 : vector<16x1xf32> to vector<16x16xf32>
    %91 = arith.subf %87, %90 : vector<16x16xf32>
    %92 = math.exp %91 : vector<16x16xf32>
    %cst_49 = arith.constant dense<0.000000e+00> : vector<16xf32>
    %93 = vector.multi_reduction <add>, %92, %cst_49 [1] : vector<16x16xf32> to vector<16xf32>
    %94 = vector.shape_cast %93 : vector<16xf32> to vector<16x1xf32>
    %95 = tpu.reciprocal %94 {approx = true} : vector<16x1xf32> -> vector<16x1xf32>
    %96 = vector.broadcast %95 : vector<16x1xf32> to vector<16x16xf32>
    %97 = arith.mulf %92, %96 : vector<16x16xf32>
    %cst_50 = arith.constant dense<0.000000e+00> : vector<16x8xf32>
    %98 = tpu.matmul %97, %83, %cst_50 {dimension_numbers = #tpu.dot_dimension_numbers<[1], [0], [0], [1], [0, 0, 1, 1], [], []>} : vector<16x16xf32>, vector<16x8xf32>, vector<16x8xf32> -> vector<16x8xf32>
    %99 = vector.extract_strided_slice %4 {offsets = [24, 0], sizes = [8, 32], strides = [1, 1]} : vector<32x32xf32> to vector<8x32xf32>
    %cst_51 = arith.constant dense<0.000000e+00> : vector<16x32xf32>
    %100 = tpu.matmul %98, %99, %cst_51 {dimension_numbers = #tpu.dot_dimension_numbers<[1], [0], [0], [1], [0, 0, 1, 1], [], []>} : vector<16x8xf32>, vector<8x32xf32>, vector<16x32xf32> -> vector<16x32xf32>
    %101 = arith.addf %80, %100 : vector<16x32xf32>
    %102 = vector.broadcast %5 : vector<1x32xf32> to vector<16x32xf32>
    %103 = arith.addf %101, %102 : vector<16x32xf32>
    %104 = arith.addf %0, %103 : vector<16x32xf32>
    %cst_52 = arith.constant dense<0.000000e+00> : vector<16xf32>
    %105 = vector.multi_reduction <add>, %104, %cst_52 [1] : vector<16x32xf32> to vector<16xf32>
    %106 = vector.shape_cast %105 : vector<16xf32> to vector<16x1xf32>
    %cst_53 = arith.constant 3.200000e+01 : f32
    %107 = vector.broadcast %cst_53 : f32 to vector<16x1xf32>
    %108 = arith.divf %106, %107 : vector<16x1xf32>
    %109 = vector.broadcast %108 : vector<16x1xf32> to vector<16x32xf32>
    %110 = arith.subf %104, %109 : vector<16x32xf32>
    %111 = arith.mulf %110, %110 : vector<16x32xf32>
    %cst_54 = arith.constant dense<0.000000e+00> : vector<16xf32>
    %112 = vector.multi_reduction <add>, %111, %cst_54 [1] : vector<16x32xf32> to vector<16xf32>
    %113 = vector.shape_cast %112 : vector<16xf32> to vector<16x1xf32>
    %cst_55 = arith.constant 3.200000e+01 : f32
    %114 = vector.broadcast %cst_55 : f32 to vector<16x1xf32>
    %115 = arith.divf %113, %114 : vector<16x1xf32>
    %116 = vector.broadcast %108 : vector<16x1xf32> to vector<16x32xf32>
    %117 = arith.subf %104, %116 : vector<16x32xf32>
    %cst_56 = arith.constant 9.99999974E-6 : f32
    %118 = vector.broadcast %cst_56 : f32 to vector<16x1xf32>
    %119 = arith.addf %115, %118 : vector<16x1xf32>
    %120 = math.sqrt %119 : vector<16x1xf32>
    %121 = vector.broadcast %120 : vector<16x1xf32> to vector<16x32xf32>
    %122 = arith.divf %117, %121 : vector<16x32xf32>
    %123 = vector.broadcast %10 : vector<1x32xf32> to vector<16x32xf32>
    %124 = arith.mulf %122, %123 : vector<16x32xf32>
    %125 = vector.broadcast %11 : vector<1x32xf32> to vector<16x32xf32>
    %126 = arith.addf %124, %125 : vector<16x32xf32>
    %cst_57 = arith.constant dense<0.000000e+00> : vector<16x64xf32>
    %127 = tpu.matmul %126, %6, %cst_57 {dimension_numbers = #tpu.dot_dimension_numbers<[1], [0], [0], [1], [0, 0, 1, 1], [], []>} : vector<16x32xf32>, vector<32x64xf32>, vector<16x64xf32> -> vector<16x64xf32>
    %128 = vector.broadcast %7 : vector<1x64xf32> to vector<16x64xf32>
    %129 = arith.addf %127, %128 : vector<16x64xf32>
    %cst_58 = arith.constant 0.000000e+00 : f32
    %130 = vector.broadcast %cst_58 : f32 to vector<16x64xf32>
    %131 = arith.maximumf %129, %130 : vector<16x64xf32>
    %cst_59 = arith.constant dense<0.000000e+00> : vector<16x32xf32>
    %132 = tpu.matmul %131, %8, %cst_59 {dimension_numbers = #tpu.dot_dimension_numbers<[1], [0], [0], [1], [0, 0, 1, 1], [], []>} : vector<16x64xf32>, vector<64x32xf32>, vector<16x32xf32> -> vector<16x32xf32>
    %133 = vector.broadcast %9 : vector<1x32xf32> to vector<16x32xf32>
    %134 = arith.addf %132, %133 : vector<16x32xf32>
    %135 = arith.addf %126, %134 : vector<16x32xf32>
    %cst_60 = arith.constant dense<0.000000e+00> : vector<16xf32>
    %136 = vector.multi_reduction <add>, %135, %cst_60 [1] : vector<16x32xf32> to vector<16xf32>
    %137 = vector.shape_cast %136 : vector<16xf32> to vector<16x1xf32>
    %cst_61 = arith.constant 3.200000e+01 : f32
    %138 = vector.broadcast %cst_61 : f32 to vector<16x1xf32>
    %139 = arith.divf %137, %138 : vector<16x1xf32>
    %140 = vector.broadcast %139 : vector<16x1xf32> to vector<16x32xf32>
    %141 = arith.subf %135, %140 : vector<16x32xf32>
    %142 = arith.mulf %141, %141 : vector<16x32xf32>
    %cst_62 = arith.constant dense<0.000000e+00> : vector<16xf32>
    %143 = vector.multi_reduction <add>, %142, %cst_62 [1] : vector<16x32xf32> to vector<16xf32>
    %144 = vector.shape_cast %143 : vector<16xf32> to vector<16x1xf32>
    %cst_63 = arith.constant 3.200000e+01 : f32
    %145 = vector.broadcast %cst_63 : f32 to vector<16x1xf32>
    %146 = arith.divf %144, %145 : vector<16x1xf32>
    %147 = vector.broadcast %139 : vector<16x1xf32> to vector<16x32xf32>
    %148 = arith.subf %135, %147 : vector<16x32xf32>
    %cst_64 = arith.constant 9.99999974E-6 : f32
    %149 = vector.broadcast %cst_64 : f32 to vector<16x1xf32>
    %150 = arith.addf %146, %149 : vector<16x1xf32>
    %151 = math.sqrt %150 : vector<16x1xf32>
    %152 = vector.broadcast %151 : vector<16x1xf32> to vector<16x32xf32>
    %153 = arith.divf %148, %152 : vector<16x32xf32>
    %154 = vector.broadcast %12 : vector<1x32xf32> to vector<16x32xf32>
    %155 = arith.mulf %153, %154 : vector<16x32xf32>
    %156 = vector.broadcast %13 : vector<1x32xf32> to vector<16x32xf32>
    %157 = arith.addf %155, %156 : vector<16x32xf32>
    %cst_65 = arith.constant dense<0.000000e+00> : vector<16x96xf32>
    %158 = tpu.matmul %157, %2, %cst_65 {dimension_numbers = #tpu.dot_dimension_numbers<[1], [0], [0], [1], [0, 0, 1, 1], [], []>} : vector<16x32xf32>, vector<32x96xf32>, vector<16x96xf32> -> vector<16x96xf32>
    %159 = vector.broadcast %3 : vector<1x96xf32> to vector<16x96xf32>
    %160 = arith.addf %158, %159 : vector<16x96xf32>
    %cst_66 = arith.constant 0.000000e+00 : f32
    %161 = vector.broadcast %cst_66 : f32 to vector<16x32xf32>
    %162 = vector.extract_strided_slice %160 {offsets = [0, 0], sizes = [16, 8], strides = [1, 1]} : vector<16x96xf32> to vector<16x8xf32>
    %163 = vector.extract_strided_slice %160 {offsets = [0, 32], sizes = [16, 8], strides = [1, 1]} : vector<16x96xf32> to vector<16x8xf32>
    %164 = vector.extract_strided_slice %160 {offsets = [0, 64], sizes = [16, 8], strides = [1, 1]} : vector<16x96xf32> to vector<16x8xf32>
    %cst_67 = arith.constant dense<0.000000e+00> : vector<16x16xf32>
    %165 = tpu.matmul %162, %163, %cst_67 {dimension_numbers = #tpu.dot_dimension_numbers<[1], [1], [0], [0], [0, 0, 1, 0], [], []>} : vector<16x8xf32>, vector<16x8xf32>, vector<16x16xf32> -> vector<16x16xf32>
    %cst_68 = arith.constant 0.353553385 : f32
    %166 = vector.broadcast %cst_68 : f32 to vector<16x16xf32>
    %167 = arith.mulf %165, %166 : vector<16x16xf32>
    %168 = arith.addf %167, %1 : vector<16x16xf32>
    %cst_69 = arith.constant dense<0xFF800000> : vector<16xf32>
    %169 = vector.multi_reduction <maximumf>, %168, %cst_69 [1] : vector<16x16xf32> to vector<16xf32>
    %170 = vector.shape_cast %169 : vector<16xf32> to vector<16x1xf32>
    %171 = vector.broadcast %170 : vector<16x1xf32> to vector<16x16xf32>
    %172 = arith.subf %168, %171 : vector<16x16xf32>
    %173 = math.exp %172 : vector<16x16xf32>
    %cst_70 = arith.constant dense<0.000000e+00> : vector<16xf32>
    %174 = vector.multi_reduction <add>, %173, %cst_70 [1] : vector<16x16xf32> to vector<16xf32>
    %175 = vector.shape_cast %174 : vector<16xf32> to vector<16x1xf32>
    %176 = tpu.reciprocal %175 {approx = true} : vector<16x1xf32> -> vector<16x1xf32>
    %177 = vector.broadcast %176 : vector<16x1xf32> to vector<16x16xf32>
    %178 = arith.mulf %173, %177 : vector<16x16xf32>
    %cst_71 = arith.constant dense<0.000000e+00> : vector<16x8xf32>
    %179 = tpu.matmul %178, %164, %cst_71 {dimension_numbers = #tpu.dot_dimension_numbers<[1], [0], [0], [1], [0, 0, 1, 1], [], []>} : vector<16x16xf32>, vector<16x8xf32>, vector<16x8xf32> -> vector<16x8xf32>
    %180 = vector.extract_strided_slice %4 {offsets = [0, 0], sizes = [8, 32], strides = [1, 1]} : vector<32x32xf32> to vector<8x32xf32>
    %cst_72 = arith.constant dense<0.000000e+00> : vector<16x32xf32>
    %181 = tpu.matmul %179, %180, %cst_72 {dimension_numbers = #tpu.dot_dimension_numbers<[1], [0], [0], [1], [0, 0, 1, 1], [], []>} : vector<16x8xf32>, vector<8x32xf32>, vector<16x32xf32> -> vector<16x32xf32>
    %182 = arith.addf %161, %181 : vector<16x32xf32>
    %183 = vector.extract_strided_slice %160 {offsets = [0, 8], sizes = [16, 8], strides = [1, 1]} : vector<16x96xf32> to vector<16x8xf32>
    %184 = vector.extract_strided_slice %160 {offsets = [0, 40], sizes = [16, 8], strides = [1, 1]} : vector<16x96xf32> to vector<16x8xf32>
    %185 = vector.extract_strided_slice %160 {offsets = [0, 72], sizes = [16, 8], strides = [1, 1]} : vector<16x96xf32> to vector<16x8xf32>
    %cst_73 = arith.constant dense<0.000000e+00> : vector<16x16xf32>
    %186 = tpu.matmul %183, %184, %cst_73 {dimension_numbers = #tpu.dot_dimension_numbers<[1], [1], [0], [0], [0, 0, 1, 0], [], []>} : vector<16x8xf32>, vector<16x8xf32>, vector<16x16xf32> -> vector<16x16xf32>
    %cst_74 = arith.constant 0.353553385 : f32
    %187 = vector.broadcast %cst_74 : f32 to vector<16x16xf32>
    %188 = arith.mulf %186, %187 : vector<16x16xf32>
    %189 = arith.addf %188, %1 : vector<16x16xf32>
    %cst_75 = arith.constant dense<0xFF800000> : vector<16xf32>
    %190 = vector.multi_reduction <maximumf>, %189, %cst_75 [1] : vector<16x16xf32> to vector<16xf32>
    %191 = vector.shape_cast %190 : vector<16xf32> to vector<16x1xf32>
    %192 = vector.broadcast %191 : vector<16x1xf32> to vector<16x16xf32>
    %193 = arith.subf %189, %192 : vector<16x16xf32>
    %194 = math.exp %193 : vector<16x16xf32>
    %cst_76 = arith.constant dense<0.000000e+00> : vector<16xf32>
    %195 = vector.multi_reduction <add>, %194, %cst_76 [1] : vector<16x16xf32> to vector<16xf32>
    %196 = vector.shape_cast %195 : vector<16xf32> to vector<16x1xf32>
    %197 = tpu.reciprocal %196 {approx = true} : vector<16x1xf32> -> vector<16x1xf32>
    %198 = vector.broadcast %197 : vector<16x1xf32> to vector<16x16xf32>
    %199 = arith.mulf %194, %198 : vector<16x16xf32>
    %cst_77 = arith.constant dense<0.000000e+00> : vector<16x8xf32>
    %200 = tpu.matmul %199, %185, %cst_77 {dimension_numbers = #tpu.dot_dimension_numbers<[1], [0], [0], [1], [0, 0, 1, 1], [], []>} : vector<16x16xf32>, vector<16x8xf32>, vector<16x8xf32> -> vector<16x8xf32>
    %201 = vector.extract_strided_slice %4 {offsets = [8, 0], sizes = [8, 32], strides = [1, 1]} : vector<32x32xf32> to vector<8x32xf32>
    %cst_78 = arith.constant dense<0.000000e+00> : vector<16x32xf32>
    %202 = tpu.matmul %200, %201, %cst_78 {dimension_numbers = #tpu.dot_dimension_numbers<[1], [0], [0], [1], [0, 0, 1, 1], [], []>} : vector<16x8xf32>, vector<8x32xf32>, vector<16x32xf32> -> vector<16x32xf32>
    %203 = arith.addf %182, %202 : vector<16x32xf32>
    %204 = vector.extract_strided_slice %160 {offsets = [0, 16], sizes = [16, 8], strides = [1, 1]} : vector<16x96xf32> to vector<16x8xf32>
    %205 = vector.extract_strided_slice %160 {offsets = [0, 48], sizes = [16, 8], strides = [1, 1]} : vector<16x96xf32> to vector<16x8xf32>
    %206 = vector.extract_strided_slice %160 {offsets = [0, 80], sizes = [16, 8], strides = [1, 1]} : vector<16x96xf32> to vector<16x8xf32>
    %cst_79 = arith.constant dense<0.000000e+00> : vector<16x16xf32>
    %207 = tpu.matmul %204, %205, %cst_79 {dimension_numbers = #tpu.dot_dimension_numbers<[1], [1], [0], [0], [0, 0, 1, 0], [], []>} : vector<16x8xf32>, vector<16x8xf32>, vector<16x16xf32> -> vector<16x16xf32>
    %cst_80 = arith.constant 0.353553385 : f32
    %208 = vector.broadcast %cst_80 : f32 to vector<16x16xf32>
    %209 = arith.mulf %207, %208 : vector<16x16xf32>
    %210 = arith.addf %209, %1 : vector<16x16xf32>
    %cst_81 = arith.constant dense<0xFF800000> : vector<16xf32>
    %211 = vector.multi_reduction <maximumf>, %210, %cst_81 [1] : vector<16x16xf32> to vector<16xf32>
    %212 = vector.shape_cast %211 : vector<16xf32> to vector<16x1xf32>
    %213 = vector.broadcast %212 : vector<16x1xf32> to vector<16x16xf32>
    %214 = arith.subf %210, %213 : vector<16x16xf32>
    %215 = math.exp %214 : vector<16x16xf32>
    %cst_82 = arith.constant dense<0.000000e+00> : vector<16xf32>
    %216 = vector.multi_reduction <add>, %215, %cst_82 [1] : vector<16x16xf32> to vector<16xf32>
    %217 = vector.shape_cast %216 : vector<16xf32> to vector<16x1xf32>
    %218 = tpu.reciprocal %217 {approx = true} : vector<16x1xf32> -> vector<16x1xf32>
    %219 = vector.broadcast %218 : vector<16x1xf32> to vector<16x16xf32>
    %220 = arith.mulf %215, %219 : vector<16x16xf32>
    %cst_83 = arith.constant dense<0.000000e+00> : vector<16x8xf32>
    %221 = tpu.matmul %220, %206, %cst_83 {dimension_numbers = #tpu.dot_dimension_numbers<[1], [0], [0], [1], [0, 0, 1, 1], [], []>} : vector<16x16xf32>, vector<16x8xf32>, vector<16x8xf32> -> vector<16x8xf32>
    %222 = vector.extract_strided_slice %4 {offsets = [16, 0], sizes = [8, 32], strides = [1, 1]} : vector<32x32xf32> to vector<8x32xf32>
    %cst_84 = arith.constant dense<0.000000e+00> : vector<16x32xf32>
    %223 = tpu.matmul %221, %222, %cst_84 {dimension_numbers = #tpu.dot_dimension_numbers<[1], [0], [0], [1], [0, 0, 1, 1], [], []>} : vector<16x8xf32>, vector<8x32xf32>, vector<16x32xf32> -> vector<16x32xf32>
    %224 = arith.addf %203, %223 : vector<16x32xf32>
    %225 = vector.extract_strided_slice %160 {offsets = [0, 24], sizes = [16, 8], strides = [1, 1]} : vector<16x96xf32> to vector<16x8xf32>
    %226 = vector.extract_strided_slice %160 {offsets = [0, 56], sizes = [16, 8], strides = [1, 1]} : vector<16x96xf32> to vector<16x8xf32>
    %227 = vector.extract_strided_slice %160 {offsets = [0, 88], sizes = [16, 8], strides = [1, 1]} : vector<16x96xf32> to vector<16x8xf32>
    %cst_85 = arith.constant dense<0.000000e+00> : vector<16x16xf32>
    %228 = tpu.matmul %225, %226, %cst_85 {dimension_numbers = #tpu.dot_dimension_numbers<[1], [1], [0], [0], [0, 0, 1, 0], [], []>} : vector<16x8xf32>, vector<16x8xf32>, vector<16x16xf32> -> vector<16x16xf32>
    %cst_86 = arith.constant 0.353553385 : f32
    %229 = vector.broadcast %cst_86 : f32 to vector<16x16xf32>
    %230 = arith.mulf %228, %229 : vector<16x16xf32>
    %231 = arith.addf %230, %1 : vector<16x16xf32>
    %cst_87 = arith.constant dense<0xFF800000> : vector<16xf32>
    %232 = vector.multi_reduction <maximumf>, %231, %cst_87 [1] : vector<16x16xf32> to vector<16xf32>
    %233 = vector.shape_cast %232 : vector<16xf32> to vector<16x1xf32>
    %234 = vector.broadcast %233 : vector<16x1xf32> to vector<16x16xf32>
    %235 = arith.subf %231, %234 : vector<16x16xf32>
    %236 = math.exp %235 : vector<16x16xf32>
    %cst_88 = arith.constant dense<0.000000e+00> : vector<16xf32>
    %237 = vector.multi_reduction <add>, %236, %cst_88 [1] : vector<16x16xf32> to vector<16xf32>
    %238 = vector.shape_cast %237 : vector<16xf32> to vector<16x1xf32>
    %239 = tpu.reciprocal %238 {approx = true} : vector<16x1xf32> -> vector<16x1xf32>
    %240 = vector.broadcast %239 : vector<16x1xf32> to vector<16x16xf32>
    %241 = arith.mulf %236, %240 : vector<16x16xf32>
    %cst_89 = arith.constant dense<0.000000e+00> : vector<16x8xf32>
    %242 = tpu.matmul %241, %227, %cst_89 {dimension_numbers = #tpu.dot_dimension_numbers<[1], [0], [0], [1], [0, 0, 1, 1], [], []>} : vector<16x16xf32>, vector<16x8xf32>, vector<16x8xf32> -> vector<16x8xf32>
    %243 = vector.extract_strided_slice %4 {offsets = [24, 0], sizes = [8, 32], strides = [1, 1]} : vector<32x32xf32> to vector<8x32xf32>
    %cst_90 = arith.constant dense<0.000000e+00> : vector<16x32xf32>
    %244 = tpu.matmul %242, %243, %cst_90 {dimension_numbers = #tpu.dot_dimension_numbers<[1], [0], [0], [1], [0, 0, 1, 1], [], []>} : vector<16x8xf32>, vector<8x32xf32>, vector<16x32xf32> -> vector<16x32xf32>
    %245 = arith.addf %224, %244 : vector<16x32xf32>
    %246 = vector.broadcast %5 : vector<1x32xf32> to vector<16x32xf32>
    %247 = arith.addf %245, %246 : vector<16x32xf32>
    %248 = arith.addf %157, %247 : vector<16x32xf32>
    %cst_91 = arith.constant dense<0.000000e+00> : vector<16xf32>
    %249 = vector.multi_reduction <add>, %248, %cst_91 [1] : vector<16x32xf32> to vector<16xf32>
    %250 = vector.shape_cast %249 : vector<16xf32> to vector<16x1xf32>
    %cst_92 = arith.constant 3.200000e+01 : f32
    %251 = vector.broadcast %cst_92 : f32 to vector<16x1xf32>
    %252 = arith.divf %250, %251 : vector<16x1xf32>
    %253 = vector.broadcast %252 : vector<16x1xf32> to vector<16x32xf32>
    %254 = arith.subf %248, %253 : vector<16x32xf32>
    %255 = arith.mulf %254, %254 : vector<16x32xf32>
    %cst_93 = arith.constant dense<0.000000e+00> : vector<16xf32>
    %256 = vector.multi_reduction <add>, %255, %cst_93 [1] : vector<16x32xf32> to vector<16xf32>
    %257 = vector.shape_cast %256 : vector<16xf32> to vector<16x1xf32>
    %cst_94 = arith.constant 3.200000e+01 : f32
    %258 = vector.broadcast %cst_94 : f32 to vector<16x1xf32>
    %259 = arith.divf %257, %258 : vector<16x1xf32>
    %260 = vector.broadcast %252 : vector<16x1xf32> to vector<16x32xf32>
    %261 = arith.subf %248, %260 : vector<16x32xf32>
    %cst_95 = arith.constant 9.99999974E-6 : f32
    %262 = vector.broadcast %cst_95 : f32 to vector<16x1xf32>
    %263 = arith.addf %259, %262 : vector<16x1xf32>
    %264 = math.sqrt %263 : vector<16x1xf32>
    %265 = vector.broadcast %264 : vector<16x1xf32> to vector<16x32xf32>
    %266 = arith.divf %261, %265 : vector<16x32xf32>
    %267 = vector.broadcast %10 : vector<1x32xf32> to vector<16x32xf32>
    %268 = arith.mulf %266, %267 : vector<16x32xf32>
    %269 = vector.broadcast %11 : vector<1x32xf32> to vector<16x32xf32>
    %270 = arith.addf %268, %269 : vector<16x32xf32>
    %cst_96 = arith.constant dense<0.000000e+00> : vector<16x64xf32>
    %271 = tpu.matmul %270, %6, %cst_96 {dimension_numbers = #tpu.dot_dimension_numbers<[1], [0], [0], [1], [0, 0, 1, 1], [], []>} : vector<16x32xf32>, vector<32x64xf32>, vector<16x64xf32> -> vector<16x64xf32>
    %272 = vector.broadcast %7 : vector<1x64xf32> to vector<16x64xf32>
    %273 = arith.addf %271, %272 : vector<16x64xf32>
    %cst_97 = arith.constant 0.000000e+00 : f32
    %274 = vector.broadcast %cst_97 : f32 to vector<16x64xf32>
    %275 = arith.maximumf %273, %274 : vector<16x64xf32>
    %cst_98 = arith.constant dense<0.000000e+00> : vector<16x32xf32>
    %276 = tpu.matmul %275, %8, %cst_98 {dimension_numbers = #tpu.dot_dimension_numbers<[1], [0], [0], [1], [0, 0, 1, 1], [], []>} : vector<16x64xf32>, vector<64x32xf32>, vector<16x32xf32> -> vector<16x32xf32>
    %277 = vector.broadcast %9 : vector<1x32xf32> to vector<16x32xf32>
    %278 = arith.addf %276, %277 : vector<16x32xf32>
    %279 = arith.addf %270, %278 : vector<16x32xf32>
    %cst_99 = arith.constant dense<0.000000e+00> : vector<16xf32>
    %280 = vector.multi_reduction <add>, %279, %cst_99 [1] : vector<16x32xf32> to vector<16xf32>
    %281 = vector.shape_cast %280 : vector<16xf32> to vector<16x1xf32>
    %cst_100 = arith.constant 3.200000e+01 : f32
    %282 = vector.broadcast %cst_100 : f32 to vector<16x1xf32>
    %283 = arith.divf %281, %282 : vector<16x1xf32>
    %284 = vector.broadcast %283 : vector<16x1xf32> to vector<16x32xf32>
    %285 = arith.subf %279, %284 : vector<16x32xf32>
    %286 = arith.mulf %285, %285 : vector<16x32xf32>
    %cst_101 = arith.constant dense<0.000000e+00> : vector<16xf32>
    %287 = vector.multi_reduction <add>, %286, %cst_101 [1] : vector<16x32xf32> to vector<16xf32>
    %288 = vector.shape_cast %287 : vector<16xf32> to vector<16x1xf32>
    %cst_102 = arith.constant 3.200000e+01 : f32
    %289 = vector.broadcast %cst_102 : f32 to vector<16x1xf32>
    %290 = arith.divf %288, %289 : vector<16x1xf32>
    %291 = vector.broadcast %283 : vector<16x1xf32> to vector<16x32xf32>
    %292 = arith.subf %279, %291 : vector<16x32xf32>
    %cst_103 = arith.constant 9.99999974E-6 : f32
    %293 = vector.broadcast %cst_103 : f32 to vector<16x1xf32>
    %294 = arith.addf %290, %293 : vector<16x1xf32>
    %295 = math.sqrt %294 : vector<16x1xf32>
    %296 = vector.broadcast %295 : vector<16x1xf32> to vector<16x32xf32>
    %297 = arith.divf %292, %296 : vector<16x32xf32>
    %298 = vector.broadcast %12 : vector<1x32xf32> to vector<16x32xf32>
    %299 = arith.mulf %297, %298 : vector<16x32xf32>
    %300 = vector.broadcast %13 : vector<1x32xf32> to vector<16x32xf32>
    %301 = arith.addf %299, %300 : vector<16x32xf32>
    %c0_104 = arith.constant 0 : index
    %c0_105 = arith.constant 0 : index
    %302 = vector.load %arg14[%c0_104, %c0_105] : memref<16x32xf32, #tpu.memory_space<vmem>>, vector<16x32xf32>
    tpu.vector_store %arg14[%c0_104, %c0_105], %301 {strides = array<i32>} : memref<16x32xf32, #tpu.memory_space<vmem>>, vector<16x32xf32>,
    return
  }
}

</mosaic_0001>

<bundles_post_ra>
// kernel: tpu_custom_call.1
= control target key start
LH: loop header
LB: loop body
LE: loop exit
PB: predicated region body
PF: predicated region fallthrough
CT: control target
= control target key end

     0   :  { %19 = vsyncpa [#allocation3], 0  ;;  %s4420_s0 = inlined_call_operand.hbm [shape: f32[16,32], index: 0, kind: input, shape index: {}]   ;;  %s4421_s1 = inlined_call_operand.hbm [shape: f32[16,16], index: 1, kind: input, shape index: {}]   ;;  %s4422_s2 = inlined_call_operand.vmem [shape: f32[32,96], index: 2, kind: input, shape index: {}]   ;;  %s4423_s3 = inlined_call_operand.vmem [shape: f32[1,96], index: 3, kind: input, shape index: {}]   ;;  %s4424_s4 = inlined_call_operand.vmem [shape: f32[32,32], index: 4, kind: input, shape index: {}]   ;;  %s4425_s5 = inlined_call_operand.vmem [shape: f32[1,32], index: 5, kind: input, shape index: {}]   ;;  %s4426_s6 = inlined_call_operand.vmem [shape: f32[32,64], index: 6, kind: input, shape index: {}]   ;;  %s4427_s7 = inlined_call_operand.vmem [shape: f32[1,64], index: 7, kind: input, shape index: {}]   ;;  %s4428_s8 = inlined_call_operand.vmem [shape: f32[64,32], index: 8, kind: input, shape index: {}]   ;;  %s4429_s9 = inlined_call_operand.vmem [shape: f32[1,32], index: 9, kind: input, shape index: {}]   ;;  %s4430_s10 = inlined_call_operand.vmem [shape: f32[1,32], index: 10, kind: input, shape index: {}]   ;;  %s4431_s11 = inlined_call_operand.vmem [shape: f32[1,32], index: 11, kind: input, shape index: {}]   ;;  %s4432_s12 = inlined_call_operand.vmem [shape: f32[1,32], index: 12, kind: input, shape index: {}]   ;;  %s4433_s13 = inlined_call_operand.vmem [shape: f32[1,32], index: 13, kind: input, shape index: {}]   ;;  %s4434_s14 = inlined_call_operand.hbm [shape: f32[16,32], index: 14, kind: output, shape index: {}]  }
   0x1   :  { %20 = vsyncpa [#allocation6], 0 }
   0x2   :  { %21 = vsyncpa [#allocation4], 0  ;;  %s3773_s29 = smov [#allocation2]  }
   0x3   :  { %s27_s30 = sshll.u32 %s3773_s29, 4  ;;  %s28_s30 = int_to_ptr.vmem [resolvable:$true] %s27_s30 }
   0x4   :  { %s3715_s15 = scalar_lea.vmem %s28_s30, 256  ;;  %p3720_p1 = scmp.lt.s32.totalorder %s28_s30, %s28_s30 }
   0x5   :  { %p3716_p0 = scmp.ne.s32.totalorder %s28_s30, %s3715_s15  ;;  %p3721_p2 = scmp.lt.s32.totalorder %s3715_s15, %s3715_s15 }
   0x7   :  { %p3722_p3 = por %p3721_p2, %p3720_p1 }
   0x9   :  { %p3723_p4 = pnand %p3722_p3, %p3716_p0 }
   0xb   :  { %3726 = shalt.err (!%p3723_p4)
}
   0xc   :  { %s3774_s16 = smov 128   ;;  %s3775_s17 = smov 8  }
   0xd   :  { %33 = dma.hbm_to_vmem [thread:$0]  %s4420_s0, 256, %s28_s30, [#allocation3], %s3774_s16, %s3774_s16, %s3775_s17  }
   0xe   :  { %s3776_s20 = smov [#allocation5]  }
   0xf   :  { %s39_s21 = sshll.u32 %s3776_s20, 4  ;;  %s40_s21 = int_to_ptr.vmem [resolvable:$true] %s39_s21 }
  0x10   :  { %s3735_s22 = scalar_lea.vmem %s40_s21, 256  ;;  %p3740_p6 = scmp.lt.s32.totalorder %s40_s21, %s40_s21 }
  0x11   :  { %p3736_p5 = scmp.ne.s32.totalorder %s40_s21, %s3735_s22  ;;  %p3741_p7 = scmp.lt.s32.totalorder %s3735_s22, %s3735_s22 }
  0x13   :  { %p3742_p8 = por %p3741_p7, %p3740_p6 }
  0x15   :  { %p3743_p9 = pnand %p3742_p8, %p3736_p5 }
  0x17   :  { %3746 = shalt.err (!%p3743_p9)
}
  0x18   :  { %45 = dma.hbm_to_vmem [thread:$0]  %s4421_s1, 256, %s40_s21, [#allocation6], %s3774_s16, %s3774_s16, %s3775_s17  }
  0x19   :  { %3767 = dma.done.wait [#allocation3], 256  }
  0x1a   :  { %3768 = vsyncadd [#allocation3], 4294967040 }
  0x1b   :  { %3769 = dma.done.wait [#allocation6], 256  }
  0x1c   :  { %3770 = vsyncadd [#allocation6], 4294967040  ;;  %vm114_vm0 = vcmask 261120   ;;  %v3879_v0 = vld [vmem:[%s4422_s2 + $0x18] sm:$0xff]  ;;  %v3884_v1 = vld [vmem:[%s4422_s2 + $0x10] sm:$0xff]  ;;  %vm202_vm1 = vcmask 64512  }
  0x1d   :  { %3359 = vmatprep.subr.mxu0 %v3879_v0  ;;  %v3887_v2 = vld [vmem:[#allocation2] sm:$0xff]  ;;  %v3893_v3 = vld [vmem:[%s4422_s2 + $0x8] sm:$0xff]  ;;  %s3778_s19 = smov 96   ;;  %v3949_v18 = vld [vmem:[#allocation5 + $0x8] sm:$0xff]  ;;  %vm290_vm2 = vcmask 130048   ;;  %s3780_s20 = smov 64  }
  0x1e   :  { %3360 = vmatpush3.msra.mxu0 %v3879_v0  ;;  %3367 = vmatprep.mubr.msk.f32.mxu0 %vm114_vm0, %v3887_v2  ;;  %v3902_v4 = vld [vmem:[%s4422_s2] sm:$0xff]  ;;  %v3906_v5 = vld [vmem:[#allocation2 + $0x8] sm:$0xff]  ;;  %s3777_s2 = smov 88   ;;  %v3951_v21 = vld [vmem:[#allocation5] sm:$0xff]  ;;  %s3781_s21 = smov 56   ;;  %vm1502_vm7 = vcmask 523264  }
  0x1f   :  { %3361 = vmatprep.subr.mxu0 %v3884_v1  ;;  %v3915_v6 = vld [vmem:[%s4423_s3] ss:$0 sm:$0xff]  ;;  %s3779_s3 = smov 120   ;;  %s3782_s22 = smov 80  }
  0x20   :  { %3362 = vmatpush3.msra.mxu0 %v3884_v1  ;;  %s3783_s23 = smov 112   ;;  %s3784_s24 = smov 72  }
  0x21   :  { %3363 = vmatprep.subr.mxu0 %v3893_v3  ;;  %s3785_s0 = smov 104   ;;  %s3786_s28 = smov 48  }
  0x22   :  { %3364 = vmatpush3.msra.mxu0 %v3893_v3  ;;  %s3787_s29 = smov 40  }
  0x23   :  { %3365 = vmatprep.subr.mxu0 %v3902_v4 }
  0x24   :  { %3366 = vmatpush3.msra.mxu0 %v3902_v4 }
  0x25   :  { %3368 = vmatmul.mubr.msk.f32.vlgmr.msra.gmra.mxu0 %vm114_vm0, %v3906_v5 }
  0xe5   :  { %v3369_v7 = vpop.f32.mrf.mxu0 }
  0xe6   :  { %v3918_v8 = vadd.f32 %v3369_v7, %v3915_v6 }
  0xe7   :  { %v187_v9 = vpop.f32.mrf.mxu0 }
  0xe8   :  { %v3921_v10 = vadd.f32 %v3915_v6, %v187_v9  ;;  %406 = vrot.lane.b32.xlu1 %v3918_v8, %s3777_s2  ;;  %200 = vrot.lane.b32.xlu0 %v3918_v8, %s3778_s19 }
  0xea   :  { %3374 = vmatprep.mubr.msk.f32.mxu1 %vm202_vm1, %v3921_v10 }
  0xec   :  { %404 = vrot.lane.b32.xlu1 %v3921_v10, %s3777_s2  ;;  %198 = vrot.lane.b32.xlu0 %v3921_v10, %s3778_s19 }
  0xf0   :  { %402 = vrot.lane.b32.xlu1 %v3918_v8, %s3779_s3  ;;  %400 = vrot.lane.b32.xlu0 %v3921_v10, %s3779_s3 }
 0x15a   :  { %v201_v11 = vpop.permute.xlu0 %200  ;;  %v407_v12 = vpop.permute.xlu1 %406 }
 0x15b   :  { %3370 = vmatprep.subr.msk.mxu1 %vm202_vm1, %v201_v11 }
 0x15c   :  { %3371 = vmatpush3.xpose.msk.msra.mxu1 %vm202_vm1, %v201_v11 }
 0x15e   :  { %v199_v13 = vpop.permute.xlu0 %198  ;;  %v405_v15 = vpop.permute.xlu1 %404 }
 0x15f   :  { %3372 = vmatprep.subr.msk.mxu1 %vm202_vm1, %v199_v13 }
 0x160   :  { %3373 = vmatpush3.xpose.msk.msra.mxu1 %vm202_vm1, %v199_v13 }
 0x161   :  { %3384 = vmatprep.subr.msk.mxu1 %vm202_vm1, %v407_v12 }
 0x162   :  { %v401_v14 = vpop.permute.xlu0 %400  ;;  %v403_v16 = vpop.permute.xlu1 %402 }
 0x163   :  { %3375 = vmatmul.mubr.msk.f32.vlgmr.msra.gmra.mxu1 %vm202_vm1, %v3918_v8 }
 0x164   :  { %3385 = vmatpush3.xpose.msk.msra.mxu1 %vm202_vm1, %v407_v12  ;;  %3388 = vmatprep.mubr.msk.f32.mxu1 %vm202_vm1, %v401_v14 }
 0x165   :  { %3386 = vmatprep.subr.msk.mxu1 %vm202_vm1, %v405_v15 }
 0x168   :  { %3387 = vmatpush3.xpose.msk.msra.mxu1 %vm202_vm1, %v405_v15 }
 0x16b   :  { %3389 = vmatmul.mubr.msk.f32.vlgmr.msra.gmra.mxu1 %vm202_vm1, %v403_v16  ;;  %v3996_v16 = vld [vmem:[%s4424_s4 + $0x8] sm:$0xff] }
 0x223   :  { %v3376_v17 = vpop.f32.mrf.mxu1 }
 0x224   :  { %v287_v19 = vmul.f32 0.35355338, %v3376_v17  ;;  %v4003_v17 = vld [vmem:[%s4424_s4] sm:$0xff] }
 0x225   :  { %v277_v20 = vpop.f32.mrf.mxu1 }
 0x226   :  { %v286_v22 = vmul.f32 0.35355338, %v277_v20  ;;  %v289_v23 = vadd.f32 %v287_v19, %v3949_v18 }
 0x228   :  { %v294_v24 = vsel %vm290_vm2, %v289_v23, -inf  ;;  %v288_v25 = vadd.f32 %v286_v22, %v3951_v21 }
 0x229   :  { %295 = vmax.xlane.f32.xlu1 %v294_v24 }
 0x22a   :  { %v291_v26 = vsel %vm290_vm2, %v288_v25, -inf }
 0x22b   :  { %v3390_v27 = vpop.f32.mrf.mxu1  ;;  %292 = vmax.xlane.f32.xlu0 %v291_v26 }
 0x22c   :  { %v492_v29 = vmul.f32 0.35355338, %v3390_v27 }
 0x22d   :  { %v482_v28 = vpop.f32.mrf.mxu1 }
 0x22e   :  { %v491_v30 = vmul.f32 0.35355338, %v482_v28  ;;  %v494_v33 = vadd.f32 %v492_v29, %v3949_v18 }
 0x230   :  { %v493_v31 = vadd.f32 %v491_v30, %v3951_v21  ;;  %v498_v34 = vsel %vm290_vm2, %v494_v33, -inf }
 0x232   :  { %v495_v32 = vsel %vm290_vm2, %v493_v31, -inf }
 0x233   :  { %496 = vmax.xlane.f32.xlu0 %v495_v32 }
 0x237   :  { %499 = vmax.xlane.f32.xlu0 %v498_v34 }
 0x23a   :  { %315 = vrot.lane.b32.xlu1 %v3918_v8, %s3780_s20 }
 0x2b2   :  { %v296_v35 = vpop.xlane.xlu1 %295 }
 0x2b3   :  { %v298_v36 = vsub.f32 %v289_v23, %v296_v35 }
 0x2b4   :  { %v293_v37 = vpop.xlane.xlu0 %292 }
 0x2b5   :  { %v301_v38 = vmul.f32 1.442695, %v298_v36  ;;  %v297_v39 = vsub.f32 %v288_v25, %v293_v37 }
 0x2b6   :  { %v316_v40 = vpop.permute.xlu1 %315 }
 0x2b7   :  { %3609 = vpow2.f32 %v301_v38  ;;  %v299_v41 = vmul.f32 1.442695, %v297_v39  ;;  %3377 = vmatprep.subr.mxu0 %v316_v40 }
 0x2b8   :  { %3378 = vmatpush3.msra.mxu0 %v316_v40 }
 0x2b9   :  { %3611 = vpow2.f32 %v299_v41 }
 0x2bc   :  { %v497_v42 = vpop.xlane.xlu0 %496 }
 0x2bd   :  { %v501_v52 = vsub.f32 %v493_v31, %v497_v42 }
 0x2bf   :  { %v503_v53 = vmul.f32 1.442695, %v501_v52 }
 0x2c0   :  { %v500_v43 = vpop.xlane.xlu0 %499 }
 0x2c1   :  { %v502_v44 = vsub.f32 %v494_v33, %v500_v43 }
 0x2c3   :  { %v505_v45 = vmul.f32 1.442695, %v502_v44 }
 0x2c4   :  { %v3610_v46 = vpop.eup %3609 }
 0x2c5   :  { %3613 = vpow2.f32 %v505_v45  ;;  %v306_v47 = vsel %vm290_vm2, %v3610_v46, 0.0 }
 0x2c6   :  { %v3612_v48 = vpop.eup %3611  ;;  %307 = vadd.xlane.f32.xlu0 %v306_v47  ;;  %3615 = vpow2.f32 %v503_v53 }
 0x2c7   :  { %v303_v49 = vsel %vm290_vm2, %v3612_v48, 0.0 }
 0x2c8   :  { %304 = vadd.xlane.f32.xlu1 %v303_v49 }
 0x2d2   :  { %v3614_v50 = vpop.eup %3613 }
 0x2d3   :  { %v510_v51 = vsel %vm290_vm2, %v3614_v50, 0.0  ;;  %v3616_v54 = vpop.eup %3615 }
 0x2d4   :  { %511 = vadd.xlane.f32.xlu0 %v510_v51  ;;  %v507_v55 = vsel %vm290_vm2, %v3616_v54, 0.0 }
 0x2d9   :  { %519 = vrot.lane.b32.xlu1 %v3918_v8, %s3781_s21 }
 0x2ea   :  { %313 = vrot.lane.b32.xlu0 %v3921_v10, %s3780_s20 }
 0x2ee   :  { %772 = vrot.lane.b32.xlu0 %v3918_v8, %s3782_s22 }
 0x2f2   :  { %766 = vrot.lane.b32.xlu0 %v3921_v10, %s3783_s23 }
 0x2f6   :  { %1059 = vrot.lane.b32.xlu0 %v3918_v8, %s3784_s24 }
 0x2fa   :  { %1053 = vrot.lane.b32.xlu0 %v3921_v10, %s3785_s0 }
 0x2fd   :  { %508 = vadd.xlane.f32.xlu1 %v507_v55 }
 0x30e   :  { %517 = vrot.lane.b32.xlu1 %v3921_v10, %s3781_s21 }
 0x312   :  { %770 = vrot.lane.b32.xlu1 %v3921_v10, %s3782_s22 }
 0x316   :  { %768 = vrot.lane.b32.xlu1 %v3918_v8, %s3783_s23 }
 0x31a   :  { %1057 = vrot.lane.b32.xlu1 %v3921_v10, %s3784_s24 }
 0x31e   :  { %1055 = vrot.lane.b32.xlu1 %v3918_v8, %s3785_s0 }
 0x34f   :  { %v308_v56 = vpop.xlane.xlu0 %307 }
 0x350   :  { %3617 = vrcp.f32 %v308_v56 }
 0x351   :  { %v305_v57 = vpop.xlane.xlu1 %304 }
 0x352   :  { %3619 = vrcp.f32 %v305_v57 }
 0x355   :  { %v520_v7 = vpop.permute.xlu1 %519 }
 0x35d   :  { %v512_v58 = vpop.xlane.xlu0 %511  ;;  %v3618_v59 = vpop.eup %3617 }
 0x35e   :  { %v312_v63 = vmul.f32 %v3618_v59, %v3610_v46  ;;  %3621 = vrcp.f32 %v512_v58 }
 0x35f   :  { %v3620_v60 = vpop.eup %3619 }
 0x360   :  { %v311_v61 = vmul.f32 %v3620_v60, %v3612_v48 }
 0x361   :  { %v314_v62 = vpop.permute.xlu0 %313 }
 0x362   :  { %3379 = vmatprep.subr.mxu0 %v314_v62  ;;  %3381 = vmatprep.mubr.msk.f32.mxu0 %vm290_vm2, %v311_v61 }
 0x363   :  { %3380 = vmatpush3.msra.mxu0 %v314_v62 }
 0x364   :  { %3382 = vmatmul.mubr.msk.f32.vlgmr.msra.gmra.mxu0 %vm290_vm2, %v312_v63  ;;  %3391 = vmatprep.subr.mxu0 %v520_v7 }
 0x365   :  { %3392 = vmatpush3.msra.mxu0 %v520_v7  ;;  %v773_v20 = vpop.permute.xlu0 %772 }
 0x369   :  { %v767_v25 = vpop.permute.xlu0 %766 }
 0x36b   :  { %v3622_v12 = vpop.eup %3621 }
 0x36c   :  { %v516_v15 = vmul.f32 %v3622_v12, %v3614_v50 }
 0x36d   :  { %v1060_v27 = vpop.permute.xlu0 %1059 }
 0x371   :  { %v1054_v29 = vpop.permute.xlu0 %1053 }
 0x386   :  { %v509_v9 = vpop.xlane.xlu1 %508 }
 0x387   :  { %3623 = vrcp.f32 %v509_v9 }
 0x38a   :  { %v518_v11 = vpop.permute.xlu1 %517 }
 0x38b   :  { %3393 = vmatprep.subr.mxu0 %v518_v11 }
 0x38c   :  { %3394 = vmatpush3.msra.mxu0 %v518_v11 }
 0x38d   :  { %3398 = vmatprep.subr.mxu0 %v3996_v16 }
 0x38e   :  { %v771_v26 = vpop.permute.xlu1 %770 }
 0x392   :  { %v769_v28 = vpop.permute.xlu1 %768 }
 0x394   :  { %v3624_v13 = vpop.eup %3623 }
 0x395   :  { %v515_v14 = vmul.f32 %v3624_v13, %v3616_v54 }
 0x396   :  { %v1058_v30 = vpop.permute.xlu1 %1057 }
 0x397   :  { %3395 = vmatprep.mubr.msk.f32.mxu0 %vm290_vm2, %v515_v14 }
 0x398   :  { %3396 = vmatmul.mubr.msk.f32.vlgmr.msra.gmra.mxu0 %vm290_vm2, %v516_v15 }
 0x399   :  { %3399 = vmatpush3.msra.mxu0 %v3996_v16 }
 0x39a   :  { %3403 = vmatprep.subr.mxu0 %v4003_v17  ;;  %v1056_v31 = vpop.permute.xlu1 %1055 }
 0x424   :  { %v3383_v19 = vpop.f32.mrf.mxu0 }
 0x426   :  { %v391_v22 = vpop.f32.mrf.mxu0 }
 0x458   :  { %v3397_v23 = vpop.f32.mrf.mxu0 }
 0x45a   :  { %v595_v24 = vpop.f32.mrf.mxu0 }
 0x45b   :  { %3400 = vmatprep.mubr.msk.f32.mxu0 %vm202_vm1, %v595_v24 }
 0x45c   :  { %3401 = vmatmul.mubr.msk.f32.vlgmr.msra.gmra.mxu0 %vm202_vm1, %v3397_v23 }
 0x45d   :  { %3404 = vmatpush3.msra.mxu0 %v4003_v17  ;;  %3405 = vmatprep.mubr.msk.f32.mxu0 %vm202_vm1, %v391_v22  ;;  %v4047_v22 = vld [vmem:[%s4424_s4 + $0x10] sm:$0xff] }
 0x45e   :  { %3408 = vmatprep.subr.msk.mxu0 %vm202_vm1, %v773_v20 }
 0x460   :  { %3406 = vmatmul.mubr.msk.f32.vlgmr.msra.gmra.mxu0 %vm202_vm1, %v3383_v19 }
 0x461   :  { %3409 = vmatpush3.xpose.msk.msra.mxu0 %vm202_vm1, %v773_v20  ;;  %3412 = vmatprep.mubr.msk.f32.mxu0 %vm202_vm1, %v767_v25 }
 0x462   :  { %3410 = vmatprep.subr.msk.mxu0 %vm202_vm1, %v771_v26 }
 0x465   :  { %3411 = vmatpush3.xpose.msk.msra.mxu0 %vm202_vm1, %v771_v26 }
 0x466   :  { %3427 = vmatprep.subr.msk.mxu0 %vm202_vm1, %v1060_v27 }
 0x468   :  { %3413 = vmatmul.mubr.msk.f32.vlgmr.msra.gmra.mxu0 %vm202_vm1, %v769_v28 }
 0x469   :  { %3428 = vmatpush3.xpose.msk.msra.mxu0 %vm202_vm1, %v1060_v27  ;;  %3431 = vmatprep.mubr.msk.f32.mxu0 %vm202_vm1, %v1054_v29 }
 0x46a   :  { %3429 = vmatprep.subr.msk.mxu0 %vm202_vm1, %v1058_v30 }
 0x46d   :  { %3430 = vmatpush3.xpose.msk.msra.mxu0 %vm202_vm1, %v1058_v30 }
 0x470   :  { %3432 = vmatmul.mubr.msk.f32.vlgmr.msra.gmra.mxu0 %vm202_vm1, %v1056_v31 }
 0x51c   :  { %v3402_v32 = vpop.f32.mrf.mxu0 }
 0x51e   :  { %v676_v33 = vpop.f32.mrf.mxu0 }
 0x520   :  { %v3407_v34 = vpop.f32.mrf.mxu0 }
 0x521   :  { %v4023_v35 = vadd.f32 %v3407_v34, %v3402_v32 }
 0x522   :  { %v757_v36 = vpop.f32.mrf.mxu0 }
 0x523   :  { %v4025_v37 = vadd.f32 %v757_v36, %v676_v33 }
 0x528   :  { %v3414_v38 = vpop.f32.mrf.mxu0 }
 0x529   :  { %v858_v39 = vmul.f32 0.35355338, %v3414_v38 }
 0x52a   :  { %v848_v40 = vpop.f32.mrf.mxu0 }
 0x52b   :  { %v857_v41 = vmul.f32 0.35355338, %v848_v40  ;;  %v860_v42 = vadd.f32 %v858_v39, %v3949_v18 }
 0x52d   :  { %v864_v43 = vsel %vm290_vm2, %v860_v42, -inf  ;;  %v859_v44 = vadd.f32 %v857_v41, %v3951_v21 }
 0x52e   :  { %865 = vmax.xlane.f32.xlu1 %v864_v43 }
 0x52f   :  { %v861_v45 = vsel %vm290_vm2, %v859_v44, -inf }
 0x530   :  { %862 = vmax.xlane.f32.xlu0 %v861_v45  ;;  %v3433_v46 = vpop.f32.mrf.mxu0 }
 0x531   :  { %v1145_v9 = vmul.f32 0.35355338, %v3433_v46 }
 0x532   :  { %v1135_v47 = vpop.f32.mrf.mxu0 }
 0x533   :  { %v1144_v48 = vmul.f32 0.35355338, %v1135_v47  ;;  %v1147_v13 = vadd.f32 %v1145_v9, %v3949_v18 }
 0x535   :  { %v1146_v49 = vadd.f32 %v1144_v48, %v3951_v21  ;;  %v1151_v14 = vsel %vm290_vm2, %v1147_v13, -inf }
 0x537   :  { %v1148_v50 = vsel %vm290_vm2, %v1146_v49, -inf }
 0x53f   :  { %885 = vrot.lane.b32.xlu1 %v3918_v8, %s3786_s28 }
 0x563   :  { %1149 = vmax.xlane.f32.xlu1 %v1148_v50 }
 0x5b7   :  { %v866_v51 = vpop.xlane.xlu1 %865 }
 0x5b8   :  { %v868_v52 = vsub.f32 %v860_v42, %v866_v51 }
 0x5b9   :  { %v863_v53 = vpop.xlane.xlu0 %862 }
 0x5ba   :  { %v871_v54 = vmul.f32 1.442695, %v868_v52  ;;  %v867_v55 = vsub.f32 %v859_v44, %v863_v53 }
 0x5bb   :  { %v886_v56 = vpop.permute.xlu1 %885 }
 0x5bc   :  { %3625 = vpow2.f32 %v871_v54  ;;  %v869_v57 = vmul.f32 1.442695, %v867_v55  ;;  %3415 = vmatprep.subr.mxu1 %v886_v56 }
 0x5bd   :  { %3416 = vmatpush3.msra.mxu1 %v886_v56 }
 0x5be   :  { %3627 = vpow2.f32 %v869_v57 }
 0x5c9   :  { %v3626_v58 = vpop.eup %3625 }
 0x5ca   :  { %v876_v59 = vsel %vm290_vm2, %v3626_v58, 0.0 }
 0x5cb   :  { %v3628_v60 = vpop.eup %3627  ;;  %877 = vadd.xlane.f32.xlu0 %v876_v59 }
 0x5cc   :  { %v873_v61 = vsel %vm290_vm2, %v3628_v60, 0.0 }
 0x5cf   :  { %874 = vadd.xlane.f32.xlu0 %v873_v61 }
 0x5e5   :  { %883 = vrot.lane.b32.xlu0 %v3921_v10, %s3786_s28 }
 0x5ec   :  { %v1150_v62 = vpop.xlane.xlu1 %1149 }
 0x5ed   :  { %v1154_v63 = vsub.f32 %v1146_v49, %v1150_v62  ;;  %v4074_v49 = vld [vmem:[%s4425_s5] ss:$0 sm:$0xff] }
 0x5ef   :  { %v1156_v7 = vmul.f32 1.442695, %v1154_v63 }
 0x5f1   :  { %3629 = vpow2.f32 %v1156_v7 }
 0x5fe   :  { %v3630_v11 = vpop.eup %3629 }
 0x5ff   :  { %v1160_v12 = vsel %vm290_vm2, %v3630_v11, 0.0 }
 0x600   :  { %1161 = vadd.xlane.f32.xlu1 %v1160_v12  ;;  %v4092_v12 = vld [vmem:[%s4426_s6 + $0x10] sm:$0xff] }
 0x604   :  { %1152 = vmax.xlane.f32.xlu0 %v1151_v14  ;;  %v4106_v14 = vld [vmem:[%s4426_s6] sm:$0xff] }
 0x611   :  { %1172 = vrot.lane.b32.xlu1 %v3918_v8, %s3787_s29 }
 0x654   :  { %v878_v15 = vpop.xlane.xlu0 %877 }
 0x655   :  { %3631 = vrcp.f32 %v878_v15  ;;  %v4116_v15 = vld [vmem:[%s4428_s8 + $0x38] sm:$0xff] }
 0x658   :  { %v875_v19 = vpop.xlane.xlu0 %874 }
 0x659   :  { %3633 = vrcp.f32 %v875_v19  ;;  %v4121_v19 = vld [vmem:[%s4428_s8 + $0x30] sm:$0xff] }
 0x65c   :  { %v884_v20 = vpop.permute.xlu0 %883 }
 0x65d   :  { %3417 = vmatprep.subr.mxu1 %v884_v20 }
 0x65e   :  { %3418 = vmatpush3.msra.mxu1 %v884_v20  ;;  %v4128_v20 = vld [vmem:[%s4428_s8 + $0x28] sm:$0xff] }
 0x65f   :  { %3422 = vmatprep.subr.mxu1 %v4047_v22 }
 0x662   :  { %v3632_v23 = vpop.eup %3631 }
 0x663   :  { %v882_v26 = vmul.f32 %v3632_v23, %v3626_v58  ;;  %v4135_v23 = vld [vmem:[%s4428_s8 + $0x20] sm:$0xff] }
 0x666   :  { %v3634_v24 = vpop.eup %3633 }
 0x667   :  { %v881_v25 = vmul.f32 %v3634_v24, %v3628_v60 }
 0x669   :  { %3419 = vmatprep.mubr.msk.f32.mxu1 %vm290_vm2, %v881_v25 }
 0x66a   :  { %3420 = vmatmul.mubr.msk.f32.vlgmr.msra.gmra.mxu1 %vm290_vm2, %v882_v26 }
 0x66b   :  { %3423 = vmatpush3.msra.mxu1 %v4047_v22 }
 0x689   :  { %v1162_v8 = vpop.xlane.xlu1 %1161 }
 0x68d   :  { %v1173_v27 = vpop.permute.xlu1 %1172  ;;  %v1153_v28 = vpop.xlane.xlu0 %1152 }
 0x68e   :  { %v1155_v29 = vsub.f32 %v1147_v13, %v1153_v28  ;;  %3434 = vmatprep.subr.mxu1 %v1173_v27  ;;  %v4099_v13 = vld [vmem:[%s4426_s6 + $0x8] sm:$0xff] }
 0x690   :  { %v1158_v30 = vmul.f32 1.442695, %v1155_v29 }
 0x692   :  { %3635 = vpow2.f32 %v1158_v30 }
 0x693   :  { %3637 = vrcp.f32 %v1162_v8 }
 0x69f   :  { %v3636_v31 = vpop.eup %3635 }
 0x6a0   :  { %v1163_v32 = vsel %vm290_vm2, %v3636_v31, 0.0  ;;  %v3638_v33 = vpop.eup %3637 }
 0x6a1   :  { %1164 = vadd.xlane.f32.xlu0 %v1163_v32  ;;  %v1168_v39 = vmul.f32 %v3638_v33, %v3630_v11 }
 0x6b7   :  { %1170 = vrot.lane.b32.xlu0 %v3921_v10, %s3787_s29  ;;  %v4063_v10 = vld [vmem:[%s4424_s4 + $0x18] sm:$0xff] }
 0x72a   :  { %v3421_v34 = vpop.f32.mrf.mxu1  ;;  %v1165_v36 = vpop.xlane.xlu0 %1164 }
 0x72b   :  { %3639 = vrcp.f32 %v1165_v36 }
 0x72c   :  { %v961_v38 = vpop.f32.mrf.mxu1 }
 0x72d   :  { %3424 = vmatprep.mubr.msk.f32.mxu1 %vm202_vm1, %v961_v38 }
 0x72e   :  { %3425 = vmatmul.mubr.msk.f32.vlgmr.msra.gmra.mxu1 %vm202_vm1, %v3421_v34  ;;  %v1171_v40 = vpop.permute.xlu0 %1170 }
 0x72f   :  { %3435 = vmatpush3.msra.mxu1 %v1173_v27  ;;  %3438 = vmatprep.mubr.msk.f32.mxu1 %vm290_vm2, %v1168_v39 }
 0x730   :  { %3436 = vmatprep.subr.mxu1 %v1171_v40 }
 0x731   :  { %3437 = vmatpush3.msra.mxu1 %v1171_v40 }
 0x732   :  { %3441 = vmatprep.subr.mxu1 %v4063_v10 }
 0x738   :  { %v3640_v41 = vpop.eup %3639 }
 0x739   :  { %v1169_v42 = vmul.f32 %v3640_v41, %v3636_v31 }
 0x73b   :  { %3439 = vmatmul.mubr.msk.f32.vlgmr.msra.gmra.mxu1 %vm290_vm2, %v1169_v42 }
 0x73c   :  { %3442 = vmatpush3.msra.mxu1 %v4063_v10 }
 0x73d   :  { %3457 = vmatprep.subr.mxu1 %v4116_v15 }
 0x7ee   :  { %v3426_v43 = vpop.f32.mrf.mxu1 }
 0x7ef   :  { %v1052_v44 = vadd.f32 %v3426_v43, %v4023_v35  ;;  %v4144_v43 = vld [vmem:[%s4430_s10] ss:$0 sm:$0xff] }
 0x7f0   :  { %v1042_v45 = vpop.f32.mrf.mxu1 }
 0x7f1   :  { %v1051_v46 = vadd.f32 %v1042_v45, %v4025_v37 }
 0x7fb   :  { %v3440_v47 = vpop.f32.mrf.mxu1 }
 0x7fd   :  { %v1248_v48 = vpop.f32.mrf.mxu1 }
 0x7fe   :  { %3443 = vmatprep.mubr.msk.f32.mxu1 %vm202_vm1, %v1248_v48 }
 0x7ff   :  { %3444 = vmatmul.mubr.msk.f32.vlgmr.msra.gmra.mxu1 %vm202_vm1, %v3440_v47  ;;  %v4150_v47 = vld [vmem:[%s4431_s11] ss:$0 sm:$0xff] }
 0x800   :  { %3458 = vmatpush3.msra.mxu1 %v4116_v15 }
 0x801   :  { %3459 = vmatprep.subr.mxu1 %v4121_v19 }
 0x802   :  { %3460 = vmatpush3.msra.mxu1 %v4121_v19 }
 0x803   :  { %3461 = vmatprep.subr.mxu1 %v4128_v20 }
 0x804   :  { %3462 = vmatpush3.msra.mxu1 %v4128_v20 }
 0x805   :  { %3463 = vmatprep.subr.mxu1 %v4135_v23 }
 0x806   :  { %3464 = vmatpush3.msra.mxu1 %v4135_v23 }
 0x8bf   :  { %v3445_v50 = vpop.f32.mrf.mxu1 }
 0x8c0   :  { %v1339_v51 = vadd.f32 %v3445_v50, %v1052_v44 }
 0x8c1   :  { %v1329_v52 = vpop.f32.mrf.mxu1 }
 0x8c2   :  { %v1347_v53 = vadd.f32 %v4074_v49, %v1339_v51  ;;  %v1338_v35 = vadd.f32 %v1329_v52, %v1051_v46  ;;  %v4167_v52 = vld [vmem:[%s4428_s8 + $0x18] sm:$0xff] }
 0x8c3   :  { %3465 = vmatprep.subr.mxu1 %v4167_v52 }
 0x8c4   :  { %v1346_v54 = vadd.f32 %v4074_v49, %v1338_v35  ;;  %v1349_v37 = vadd.f32 %v1347_v53, %v3906_v5  ;;  %3466 = vmatpush3.msra.mxu1 %v4167_v52 }
 0x8c6   :  { %v1353_v55 = vsel %vm114_vm0, %v1349_v37, 0.0  ;;  %v1348_v56 = vadd.f32 %v1346_v54, %v3887_v2  ;;  %v4087_v2 = vld [vmem:[%s4426_s6 + $0x18] sm:$0xff] }
 0x8c7   :  { %1354 = vadd.xlane.f32.xlu0 %v1353_v55  ;;  %3446 = vmatprep.subr.mxu0 %v4087_v2 }
 0x8c8   :  { %v1350_v57 = vsel %vm114_vm0, %v1348_v56, 0.0  ;;  %3447 = vmatpush3.msra.mxu0 %v4087_v2 }
 0x8c9   :  { %1351 = vadd.xlane.f32.xlu1 %v1350_v57  ;;  %3448 = vmatprep.subr.mxu0 %v4092_v12  ;;  %v4204_v57 = vld [vmem:[%s4429_s9] ss:$0 sm:$0xff] }
 0x8ca   :  { %3449 = vmatpush3.msra.mxu0 %v4092_v12 }
 0x8cb   :  { %3450 = vmatprep.subr.mxu0 %v4099_v13 }
 0x8cc   :  { %3451 = vmatpush3.msra.mxu0 %v4099_v13 }
 0x8cd   :  { %3452 = vmatprep.subr.mxu0 %v4106_v14 }
 0x8ce   :  { %3453 = vmatpush3.msra.mxu0 %v4106_v14 }
 0x8cf   :  { %3476 = vmatprep.subr.mxu0 %v3879_v0 }
 0x950   :  { %v1355_v58 = vpop.xlane.xlu0 %1354 }
 0x951   :  { %v1358_v59 = vmul.f32 0.03125, %v1355_v58 }
 0x952   :  { %v1352_v60 = vpop.xlane.xlu1 %1351 }
 0x953   :  { %v1360_v61 = vsub.f32 %v1349_v37, %v1358_v59  ;;  %v1357_v62 = vmul.f32 0.03125, %v1352_v60 }
 0x955   :  { %v1359_v63 = vsub.f32 %v1348_v56, %v1357_v62  ;;  %v1362_v7 = vmul.f32 %v1360_v61, %v1360_v61 }
 0x957   :  { %v1366_v9 = vsel %vm114_vm0, %v1362_v7, 0.0  ;;  %v1361_v11 = vmul.f32 %v1359_v63, %v1359_v63 }
 0x958   :  { %1367 = vadd.xlane.f32.xlu0 %v1366_v9 }
 0x959   :  { %v1363_v5 = vsel %vm114_vm0, %v1361_v11, 0.0 }
 0x95a   :  { %1364 = vadd.xlane.f32.xlu1 %v1363_v5 }
 0x9e1   :  { %v1368_v24 = vpop.xlane.xlu0 %1367 }
 0x9e2   :  { %v1370_v25 = vmul.f32 0.03125, %v1368_v24 }
 0x9e3   :  { %v1365_v26 = vpop.xlane.xlu1 %1364 }
 0x9e4   :  { %v1372_v8 = vadd.f32 1e-05, %v1370_v25  ;;  %v1369_v27 = vmul.f32 0.03125, %v1365_v26 }
 0x9e6   :  { %3641 = vrsqrt.f32 %v1372_v8  ;;  %v1371_v28 = vadd.f32 1e-05, %v1369_v27  ;;  %vm1382_vm3 = vcmp.eq.f32.partialorder %v1372_v8, inf  ;;  %v1385_v31 = vand.u32 2147483648, %v1372_v8 }
 0x9e7   :  { %vm1384_vm4 = vcmp.eq.f32.partialorder %v1372_v8, 0.0 }
 0x9e8   :  { %3643 = vrsqrt.f32 %v1371_v28  ;;  %vm1375_vm5 = vcmp.eq.f32.partialorder %v1371_v28, inf  ;;  %v1378_v38 = vand.u32 2147483648, %v1371_v28  ;;  %vm1377_vm6 = vcmp.eq.f32.partialorder %v1371_v28, 0.0 }
 0x9f3   :  { %v3642_v29 = vpop.eup %3641 }
 0x9f4   :  { %v1381_v30 = vmul.f32 %v3642_v29, %v1372_v8 }
 0x9f5   :  { %v3644_v32 = vpop.eup %3643 }
 0x9f6   :  { %v1383_v33 = vsel %vm1382_vm3, %v1372_v8, %v1381_v30  ;;  %v1374_v36 = vmul.f32 %v3644_v32, %v1371_v28 }
 0x9f7   :  { %v1386_v34 = vsel %vm1384_vm4, %v1385_v31, %v1383_v33 }
 0x9f8   :  { %3645 = vrcp.f32 %v1386_v34  ;;  %v1376_v39 = vsel %vm1375_vm5, %v1371_v28, %v1374_v36 }
 0x9f9   :  { %v1379_v40 = vsel %vm1377_vm6, %v1378_v38, %v1376_v39 }
 0x9fa   :  { %3647 = vrcp.f32 %v1379_v40 }
 0xa05   :  { %v3646_v41 = vpop.eup %3645 }
 0xa06   :  { %v1390_v42 = vmul.f32 %v3646_v41, %v1360_v61 }
 0xa07   :  { %v3648_v44 = vpop.eup %3647 }
 0xa08   :  { %v1388_v45 = vmul.f32 %v3648_v44, %v1359_v63  ;;  %v1398_v46 = vmul.f32 %v4144_v43, %v1390_v42 }
 0xa0a   :  { %v1397_v48 = vmul.f32 %v4144_v43, %v1388_v45  ;;  %v1406_v51 = vadd.f32 %v4150_v47, %v1398_v46 }
 0xa0c   :  { %v1405_v50 = vadd.f32 %v4150_v47, %v1397_v48 }
 0xa0e   :  { %3454 = vmatprep.mubr.msk.f32.mxu0 %vm114_vm0, %v1405_v50 }
 0xa0f   :  { %3455 = vmatmul.mubr.msk.f32.vlgmr.msra.gmra.mxu0 %vm114_vm0, %v1406_v51 }
 0xa10   :  { %3477 = vmatpush3.msra.mxu0 %v3879_v0  ;;  %v4174_v0 = vld [vmem:[%s4428_s8 + $0x10] sm:$0xff] }
 0xa11   :  { %3478 = vmatprep.subr.mxu0 %v3884_v1  ;;  %3467 = vmatprep.subr.mxu1 %v4174_v0 }
 0xa12   :  { %3479 = vmatpush3.msra.mxu0 %v3884_v1  ;;  %3468 = vmatpush3.msra.mxu1 %v4174_v0  ;;  %v4181_v1 = vld [vmem:[%s4428_s8 + $0x8] sm:$0xff] }
 0xa13   :  { %3480 = vmatprep.subr.mxu0 %v3893_v3  ;;  %3469 = vmatprep.subr.mxu1 %v4181_v1 }
 0xa14   :  { %3481 = vmatpush3.msra.mxu0 %v3893_v3  ;;  %3470 = vmatpush3.msra.mxu1 %v4181_v1  ;;  %v4188_v3 = vld [vmem:[%s4428_s8] sm:$0xff] }
 0xa15   :  { %3482 = vmatprep.subr.mxu0 %v3902_v4  ;;  %3471 = vmatprep.subr.mxu1 %v4188_v3 }
 0xa16   :  { %3483 = vmatpush3.msra.mxu0 %v3902_v4  ;;  %3472 = vmatpush3.msra.mxu1 %v4188_v3  ;;  %v4195_v4 = vld [vmem:[%s4427_s7] ss:$0 sm:$0xff] }
 0xacf   :  { %v3456_v53 = vpop.f32.mrf.mxu0 }
 0xad0   :  { %v1491_v35 = vadd.f32 %v3456_v53, %v4195_v4 }
 0xad1   :  { %v1485_v54 = vpop.f32.mrf.mxu0 }
 0xad2   :  { %v1486_v37 = vadd.f32 %v4195_v4, %v1485_v54  ;;  %v1495_v56 = vmax.f32 %v1491_v35, 0.0  ;;  %v4215_v54 = vld [vmem:[%s4432_s12] ss:$0 sm:$0xff]  ;;  %s3788_s12 = smov [#allocation7]  }
 0xad4   :  { %v1494_v55 = vmax.f32 %v1486_v37, 0.0 }
 0xad6   :  { %3473 = vmatprep.mubr.msk.f32.mxu1 %vm1502_vm7, %v1494_v55 }
 0xad7   :  { %3474 = vmatmul.mubr.msk.f32.vlgmr.msra.gmra.mxu1 %vm1502_vm7, %v1495_v56 }
 0xb97   :  { %v3475_v58 = vpop.f32.mrf.mxu1 }
 0xb98   :  { %v1581_v59 = vadd.f32 %v3475_v58, %v4204_v57  ;;  %v4221_v58 = vld [vmem:[%s4433_s13] ss:$0 sm:$0xff]  ;;  %s3130_s13 = sshll.u32 %s3788_s12, 4  ;;  %s3131_s13 = int_to_ptr.vmem [resolvable:$true] %s3130_s13 }
 0xb99   :  { %v1575_v60 = vpop.f32.mrf.mxu1  ;;  %p3752_p11 = scmp.lt.s32.totalorder %s3131_s13, %s3131_s13 }
 0xb9a   :  { %v1576_v61 = vadd.f32 %v4204_v57, %v1575_v60  ;;  %v1585_v62 = vadd.f32 %v1581_v59, %v1406_v51 }
 0xb9c   :  { %v1589_v63 = vsel %vm114_vm0, %v1585_v62, 0.0  ;;  %v1584_v7 = vadd.f32 %v1576_v61, %v1405_v50 }
 0xb9d   :  { %1590 = vadd.xlane.f32.xlu0 %v1589_v63 }
 0xb9e   :  { %v1586_v9 = vsel %vm114_vm0, %v1584_v7, 0.0 }
 0xb9f   :  { %1587 = vadd.xlane.f32.xlu1 %v1586_v9 }
 0xc26   :  { %v1591_v11 = vpop.xlane.xlu0 %1590 }
 0xc27   :  { %v1593_v5 = vmul.f32 0.03125, %v1591_v11 }
 0xc28   :  { %v1588_v24 = vpop.xlane.xlu1 %1587 }
 0xc29   :  { %v1595_v25 = vsub.f32 %v1585_v62, %v1593_v5  ;;  %v1592_v26 = vmul.f32 0.03125, %v1588_v24 }
 0xc2b   :  { %v1594_v8 = vsub.f32 %v1584_v7, %v1592_v26  ;;  %v1597_v27 = vmul.f32 %v1595_v25, %v1595_v25 }
 0xc2d   :  { %v1601_v28 = vsel %vm114_vm0, %v1597_v27, 0.0  ;;  %v1596_v29 = vmul.f32 %v1594_v8, %v1594_v8 }
 0xc2e   :  { %1602 = vadd.xlane.f32.xlu0 %v1601_v28 }
 0xc2f   :  { %v1598_v30 = vsel %vm114_vm0, %v1596_v29, 0.0 }
 0xc30   :  { %1599 = vadd.xlane.f32.xlu1 %v1598_v30 }
 0xcb7   :  { %v1603_v31 = vpop.xlane.xlu0 %1602 }
 0xcb8   :  { %v1605_v32 = vmul.f32 0.03125, %v1603_v31 }
 0xcb9   :  { %v1600_v33 = vpop.xlane.xlu1 %1599 }
 0xcba   :  { %v1607_v34 = vadd.f32 1e-05, %v1605_v32  ;;  %v1604_v36 = vmul.f32 0.03125, %v1600_v33 }
 0xcbc   :  { %3649 = vrsqrt.f32 %v1607_v34  ;;  %v1606_v38 = vadd.f32 1e-05, %v1604_v36  ;;  %vm1617_vm8 = vcmp.eq.f32.partialorder %v1607_v34, inf  ;;  %v1620_v41 = vand.u32 2147483648, %v1607_v34 }
 0xcbd   :  { %vm1619_vm9 = vcmp.eq.f32.partialorder %v1607_v34, 0.0 }
 0xcbe   :  { %3651 = vrsqrt.f32 %v1606_v38  ;;  %vm1610_vm10 = vcmp.eq.f32.partialorder %v1606_v38, inf  ;;  %v1613_v48 = vand.u32 2147483648, %v1606_v38  ;;  %vm1612_vm11 = vcmp.eq.f32.partialorder %v1606_v38, 0.0 }
 0xcc9   :  { %v3650_v39 = vpop.eup %3649 }
 0xcca   :  { %v1616_v40 = vmul.f32 %v3650_v39, %v1607_v34 }
 0xccb   :  { %v3652_v42 = vpop.eup %3651 }
 0xccc   :  { %v1618_v44 = vsel %vm1617_vm8, %v1607_v34, %v1616_v40  ;;  %v1609_v46 = vmul.f32 %v3652_v42, %v1606_v38 }
 0xccd   :  { %v1621_v45 = vsel %vm1619_vm9, %v1620_v41, %v1618_v44 }
 0xcce   :  { %3653 = vrcp.f32 %v1621_v45  ;;  %v1611_v50 = vsel %vm1610_vm10, %v1606_v38, %v1609_v46 }
 0xccf   :  { %v1614_v51 = vsel %vm1612_vm11, %v1613_v48, %v1611_v50 }
 0xcd0   :  { %3655 = vrcp.f32 %v1614_v51 }
 0xcdb   :  { %v3654_v53 = vpop.eup %3653 }
 0xcdc   :  { %v1625_v35 = vmul.f32 %v3654_v53, %v1595_v25 }
 0xcdd   :  { %v3656_v37 = vpop.eup %3655 }
 0xcde   :  { %v1623_v55 = vmul.f32 %v3656_v37, %v1594_v8  ;;  %v1633_v56 = vmul.f32 %v4215_v54, %v1625_v35 }
 0xce0   :  { %v1632_v59 = vmul.f32 %v4215_v54, %v1623_v55  ;;  %v4228_v61 = vadd.f32 %v4221_v58, %v1633_v56 }
 0xce2   :  { %v4225_v60 = vadd.f32 %v4221_v58, %v1632_v59 }
 0xce4   :  { %3484 = vmatprep.mubr.msk.f32.mxu0 %vm114_vm0, %v4225_v60 }
 0xce5   :  { %3485 = vmatmul.mubr.msk.f32.vlgmr.msra.gmra.mxu0 %vm114_vm0, %v4228_v61 }
 0xda5   :  { %v3486_v62 = vpop.f32.mrf.mxu0 }
 0xda6   :  { %v4235_v63 = vadd.f32 %v3486_v62, %v3915_v6 }
 0xda7   :  { %v1714_v7 = vpop.f32.mrf.mxu0 }
 0xda8   :  { %v4238_v9 = vadd.f32 %v3915_v6, %v1714_v7  ;;  %1727 = vrot.lane.b32.xlu1 %v4235_v63, %s3778_s19 }
 0xdaa   :  { %1725 = vrot.lane.b32.xlu0 %v4238_v9, %s3778_s19  ;;  %3491 = vmatprep.mubr.msk.f32.mxu0 %vm202_vm1, %v4238_v9 }
 0xe1a   :  { %v1728_v11 = vpop.permute.xlu1 %1727 }
 0xe1b   :  { %3487 = vmatprep.subr.msk.mxu0 %vm202_vm1, %v1728_v11 }
 0xe1c   :  { %3488 = vmatpush3.xpose.msk.msra.mxu0 %vm202_vm1, %v1728_v11  ;;  %v1726_v5 = vpop.permute.xlu0 %1725 }
 0xe1d   :  { %3489 = vmatprep.subr.msk.mxu0 %vm202_vm1, %v1726_v5 }
 0xe20   :  { %3490 = vmatpush3.xpose.msk.msra.mxu0 %vm202_vm1, %v1726_v5 }
 0xe23   :  { %3492 = vmatmul.mubr.msk.f32.vlgmr.msra.gmra.mxu0 %vm202_vm1, %v4235_v63 }
 0xee3   :  { %v3493_v6 = vpop.f32.mrf.mxu0 }
 0xee4   :  { %v1813_v24 = vmul.f32 0.35355338, %v3493_v6 }
 0xee5   :  { %v1803_v25 = vpop.f32.mrf.mxu0 }
 0xee6   :  { %v1812_v26 = vmul.f32 0.35355338, %v1803_v25  ;;  %v1815_v8 = vadd.f32 %v1813_v24, %v3949_v18 }
 0xee8   :  { %v1819_v27 = vsel %vm290_vm2, %v1815_v8, -inf  ;;  %v1814_v28 = vadd.f32 %v1812_v26, %v3951_v21 }
 0xee9   :  { %1820 = vmax.xlane.f32.xlu0 %v1819_v27 }
 0xeea   :  { %v1816_v29 = vsel %vm290_vm2, %v1814_v28, -inf }
 0xeeb   :  { %1817 = vmax.xlane.f32.xlu1 %v1816_v29 }
 0xefc   :  { %1840 = vrot.lane.b32.xlu1 %v4235_v63, %s3780_s20 }
 0xf00   :  { %1931 = vrot.lane.b32.xlu1 %v4235_v63, %s3777_s2 }
 0xf04   :  { %1929 = vrot.lane.b32.xlu1 %v4238_v9, %s3777_s2  ;;  %s3747_s2 = scalar_lea.vmem %s3131_s13, 256 }
 0xf05   :  { %p3748_p10 = scmp.ne.s32.totalorder %s3131_s13, %s3747_s2  ;;  %p3753_p12 = scmp.lt.s32.totalorder %s3747_s2, %s3747_s2 }
 0xf07   :  { %p3754_p13 = por %p3753_p12, %p3752_p11 }
 0xf09   :  { %p3755_p0 = pnand %p3754_p13, %p3748_p10 }
 0xf72   :  { %v1821_v30 = vpop.xlane.xlu0 %1820 }
 0xf73   :  { %v1823_v31 = vsub.f32 %v1815_v8, %v1821_v30 }
 0xf74   :  { %v1818_v32 = vpop.xlane.xlu1 %1817 }
 0xf75   :  { %v1826_v33 = vmul.f32 1.442695, %v1823_v31  ;;  %v1822_v34 = vsub.f32 %v1814_v28, %v1818_v32 }
 0xf77   :  { %3657 = vpow2.f32 %v1826_v33  ;;  %v1824_v36 = vmul.f32 1.442695, %v1822_v34 }
 0xf78   :  { %v1841_v38 = vpop.permute.xlu1 %1840 }
 0xf79   :  { %3659 = vpow2.f32 %v1824_v36  ;;  %3494 = vmatprep.subr.mxu1 %v1841_v38 }
 0xf7a   :  { %3495 = vmatpush3.msra.mxu1 %v1841_v38 }
 0xf7c   :  { %v1932_v44 = vpop.permute.xlu1 %1931 }
 0xf80   :  { %v1930_v45 = vpop.permute.xlu1 %1929 }
 0xf84   :  { %v3658_v39 = vpop.eup %3657 }
 0xf85   :  { %v1831_v40 = vsel %vm290_vm2, %v3658_v39, 0.0 }
 0xf86   :  { %v3660_v41 = vpop.eup %3659  ;;  %1832 = vadd.xlane.f32.xlu0 %v1831_v40 }
 0xf87   :  { %v1828_v42 = vsel %vm290_vm2, %v3660_v41, 0.0 }
 0xf88   :  { %1829 = vadd.xlane.f32.xlu1 %v1828_v42 }
 0xf99   :  { %1927 = vrot.lane.b32.xlu1 %v4235_v63, %s3779_s3 }
 0xf9c   :  { %1838 = vrot.lane.b32.xlu0 %v4238_v9, %s3780_s20 }
 0xfa0   :  { %1925 = vrot.lane.b32.xlu0 %v4238_v9, %s3779_s3 }
0x100f   :  { %v1833_v46 = vpop.xlane.xlu0 %1832 }
0x1010   :  { %3661 = vrcp.f32 %v1833_v46 }
0x1011   :  { %v1830_v48 = vpop.xlane.xlu1 %1829 }
0x1012   :  { %3663 = vrcp.f32 %v1830_v48 }
0x1013   :  { %v1839_v50 = vpop.permute.xlu0 %1838 }
0x1014   :  { %3496 = vmatprep.subr.mxu1 %v1839_v50 }
0x1015   :  { %3497 = vmatpush3.msra.mxu1 %v1839_v50  ;;  %v1928_v56 = vpop.permute.xlu1 %1927 }
0x1016   :  { %3501 = vmatprep.subr.msk.mxu1 %vm202_vm1, %v1932_v44 }
0x1017   :  { %v1926_v55 = vpop.permute.xlu0 %1925 }
0x101d   :  { %v3662_v51 = vpop.eup %3661 }
0x101e   :  { %v1837_v37 = vmul.f32 %v3662_v51, %v3658_v39 }
0x101f   :  { %v3664_v53 = vpop.eup %3663 }
0x1020   :  { %v1836_v35 = vmul.f32 %v3664_v53, %v3660_v41 }
0x1022   :  { %3498 = vmatprep.mubr.msk.f32.mxu1 %vm290_vm2, %v1836_v35 }
0x1023   :  { %3499 = vmatmul.mubr.msk.f32.vlgmr.msra.gmra.mxu1 %vm290_vm2, %v1837_v37 }
0x1024   :  { %3502 = vmatpush3.xpose.msk.msra.mxu1 %vm202_vm1, %v1932_v44  ;;  %3505 = vmatprep.mubr.msk.f32.mxu1 %vm202_vm1, %v1926_v55 }
0x1025   :  { %3503 = vmatprep.subr.msk.mxu1 %vm202_vm1, %v1930_v45 }
0x1028   :  { %3504 = vmatpush3.xpose.msk.msra.mxu1 %vm202_vm1, %v1930_v45 }
0x1029   :  { %3520 = vmatprep.subr.mxu1 %v4003_v17 }
0x102b   :  { %3506 = vmatmul.mubr.msk.f32.vlgmr.msra.gmra.mxu1 %vm202_vm1, %v1928_v56 }
0x102c   :  { %3521 = vmatpush3.msra.mxu1 %v4003_v17 }
0x10e3   :  { %v3500_v59 = vpop.f32.mrf.mxu1 }
0x10e5   :  { %v1916_v62 = vpop.f32.mrf.mxu1 }
0x10e6   :  { %3522 = vmatprep.mubr.msk.f32.mxu1 %vm202_vm1, %v1916_v62 }
0x10e7   :  { %3523 = vmatmul.mubr.msk.f32.vlgmr.msra.gmra.mxu1 %vm202_vm1, %v3500_v59 }
0x10eb   :  { %v3507_v7 = vpop.f32.mrf.mxu1 }
0x10ec   :  { %v2017_v11 = vmul.f32 0.35355338, %v3507_v7 }
0x10ed   :  { %v2007_v5 = vpop.f32.mrf.mxu1 }
0x10ee   :  { %v2016_v6 = vmul.f32 0.35355338, %v2007_v5  ;;  %v2019_v24 = vadd.f32 %v2017_v11, %v3949_v18  ;;  %v3705_v5 = vld [vmem:[#allocation5 + $0x8] sm:$0xff] }
0x10f0   :  { %v2023_v25 = vsel %vm290_vm2, %v2019_v24, -inf  ;;  %v2018_v26 = vadd.f32 %v2016_v6, %v3951_v21 }
0x10f1   :  { %2024 = vmax.xlane.f32.xlu1 %v2023_v25 }
0x10f2   :  { %v2020_v8 = vsel %vm290_vm2, %v2018_v26, -inf }
0x10f3   :  { %2021 = vmax.xlane.f32.xlu0 %v2020_v8 }
0x1102   :  { %2044 = vrot.lane.b32.xlu1 %v4235_v63, %s3781_s21 }
0x1106   :  { %2297 = vrot.lane.b32.xlu1 %v4235_v63, %s3782_s22 }
0x110a   :  { %2295 = vrot.lane.b32.xlu1 %v4238_v9, %s3782_s22 }
0x110e   :  { %2293 = vrot.lane.b32.xlu1 %v4235_v63, %s3783_s23 }
0x1112   :  { %2582 = vrot.lane.b32.xlu1 %v4238_v9, %s3784_s24 }
0x1116   :  { %2580 = vrot.lane.b32.xlu1 %v4235_v63, %s3785_s0 }
0x117a   :  { %v2025_v18 = vpop.xlane.xlu1 %2024 }
0x117b   :  { %v2027_v21 = vsub.f32 %v2019_v24, %v2025_v18  ;;  %v3706_v24 = vld [vmem:[#allocation5] sm:$0xff] }
0x117c   :  { %v2022_v17 = vpop.xlane.xlu0 %2021 }
0x117d   :  { %v2030_v27 = vmul.f32 1.442695, %v2027_v21  ;;  %v2026_v28 = vsub.f32 %v2018_v26, %v2022_v17 }
0x117e   :  { %v2045_v29 = vpop.permute.xlu1 %2044 }
0x117f   :  { %3665 = vpow2.f32 %v2030_v27  ;;  %v2028_v30 = vmul.f32 1.442695, %v2026_v28  ;;  %3508 = vmatprep.subr.mxu0 %v2045_v29 }
0x1180   :  { %3509 = vmatpush3.msra.mxu0 %v2045_v29 }
0x1181   :  { %3667 = vpow2.f32 %v2028_v30 }
0x1182   :  { %v2298_v45 = vpop.permute.xlu1 %2297 }
0x1186   :  { %v2296_v50 = vpop.permute.xlu1 %2295 }
0x118a   :  { %v2294_v35 = vpop.permute.xlu1 %2293 }
0x118c   :  { %v3666_v31 = vpop.eup %3665 }
0x118d   :  { %v2035_v32 = vsel %vm290_vm2, %v3666_v31, 0.0 }
0x118e   :  { %v3668_v33 = vpop.eup %3667  ;;  %2036 = vadd.xlane.f32.xlu0 %v2035_v32  ;;  %v2583_v37 = vpop.permute.xlu1 %2582 }
0x118f   :  { %v2032_v34 = vsel %vm290_vm2, %v3668_v33, 0.0 }
0x1192   :  { %2033 = vadd.xlane.f32.xlu0 %v2032_v34  ;;  %v2581_v55 = vpop.permute.xlu1 %2580 }
0x11a8   :  { %2042 = vrot.lane.b32.xlu0 %v4238_v9, %s3781_s21 }
0x11ac   :  { %2291 = vrot.lane.b32.xlu0 %v4238_v9, %s3783_s23 }
0x11b0   :  { %2584 = vrot.lane.b32.xlu0 %v4235_v63, %s3784_s24 }
0x11b4   :  { %2578 = vrot.lane.b32.xlu0 %v4238_v9, %s3785_s0 }
0x1217   :  { %v2037_v36 = vpop.xlane.xlu0 %2036 }
0x1218   :  { %3669 = vrcp.f32 %v2037_v36 }
0x121b   :  { %v2034_v38 = vpop.xlane.xlu0 %2033 }
0x121c   :  { %3671 = vrcp.f32 %v2034_v38 }
0x121f   :  { %v2043_v39 = vpop.permute.xlu0 %2042 }
0x1220   :  { %3510 = vmatprep.subr.mxu0 %v2043_v39 }
0x1221   :  { %3511 = vmatpush3.msra.mxu0 %v2043_v39 }
0x1222   :  { %3515 = vmatprep.subr.mxu0 %v3996_v16 }
0x1223   :  { %v2292_v46 = vpop.permute.xlu0 %2291 }
0x1225   :  { %v3670_v40 = vpop.eup %3669 }
0x1226   :  { %v2041_v44 = vmul.f32 %v3670_v40, %v3666_v31 }
0x1227   :  { %v2585_v53 = vpop.permute.xlu0 %2584 }
0x1229   :  { %v3672_v41 = vpop.eup %3671 }
0x122a   :  { %v2040_v42 = vmul.f32 %v3672_v41, %v3668_v33 }
0x122c   :  { %3512 = vmatprep.mubr.msk.f32.mxu0 %vm290_vm2, %v2040_v42 }
0x122d   :  { %3513 = vmatmul.mubr.msk.f32.vlgmr.msra.gmra.mxu0 %vm290_vm2, %v2041_v44 }
0x122e   :  { %3516 = vmatpush3.msra.mxu0 %v3996_v16  ;;  %v2579_v16 = vpop.permute.xlu0 %2578 }
0x122f   :  { %3525 = vmatprep.subr.msk.mxu0 %vm202_vm1, %v2298_v45 }
0x12ed   :  { %v3514_v48 = vpop.f32.mrf.mxu0 }
0x12ef   :  { %v2120_v51 = vpop.f32.mrf.mxu0 }
0x12f0   :  { %3517 = vmatprep.mubr.msk.f32.mxu0 %vm202_vm1, %v2120_v51 }
0x12f1   :  { %3518 = vmatmul.mubr.msk.f32.vlgmr.msra.gmra.mxu0 %vm202_vm1, %v3514_v48 }
0x12f2   :  { %3526 = vmatpush3.xpose.msk.msra.mxu0 %vm202_vm1, %v2298_v45  ;;  %3529 = vmatprep.mubr.msk.f32.mxu0 %vm202_vm1, %v2292_v46 }
0x12f3   :  { %3527 = vmatprep.subr.msk.mxu0 %vm202_vm1, %v2296_v50 }
0x12f6   :  { %3528 = vmatpush3.xpose.msk.msra.mxu0 %vm202_vm1, %v2296_v50 }
0x12f7   :  { %3544 = vmatprep.subr.msk.mxu0 %vm202_vm1, %v2585_v53 }
0x12f9   :  { %3530 = vmatmul.mubr.msk.f32.vlgmr.msra.gmra.mxu0 %vm202_vm1, %v2294_v35 }
0x12fa   :  { %3545 = vmatpush3.xpose.msk.msra.mxu0 %vm202_vm1, %v2585_v53  ;;  %3548 = vmatprep.mubr.msk.f32.mxu0 %vm202_vm1, %v2579_v16 }
0x12fb   :  { %3546 = vmatprep.subr.msk.mxu0 %vm202_vm1, %v2583_v37 }
0x12fe   :  { %3547 = vmatpush3.xpose.msk.msra.mxu0 %vm202_vm1, %v2583_v37 }
0x12ff   :  { %3563 = vmatprep.subr.mxu0 %v4087_v2 }
0x1301   :  { %3549 = vmatmul.mubr.msk.f32.vlgmr.msra.gmra.mxu0 %vm202_vm1, %v2581_v55 }
0x1302   :  { %3564 = vmatpush3.msra.mxu0 %v4087_v2 }
0x1303   :  { %3565 = vmatprep.subr.mxu0 %v4092_v12 }
0x1304   :  { %3566 = vmatpush3.msra.mxu0 %v4092_v12 }
0x1305   :  { %3567 = vmatprep.subr.mxu0 %v4099_v13 }
0x1306   :  { %3568 = vmatpush3.msra.mxu0 %v4099_v13 }
0x1307   :  { %3569 = vmatprep.subr.mxu0 %v4106_v14 }
0x1308   :  { %3570 = vmatpush3.msra.mxu0 %v4106_v14 }
0x13b1   :  { %v4334_v56 = vpop.f32.mrf.mxu0 }
0x13b3   :  { %v4336_v59 = vpop.f32.mrf.mxu0 }
0x13b9   :  { %v3531_v62 = vpop.f32.mrf.mxu0 }
0x13ba   :  { %v2383_v7 = vmul.f32 0.35355338, %v3531_v62 }
0x13bb   :  { %v2373_v11 = vpop.f32.mrf.mxu0 }
0x13bc   :  { %v2382_v2 = vmul.f32 0.35355338, %v2373_v11  ;;  %v2385_v6 = vadd.f32 %v3705_v5, %v2383_v7 }
0x13be   :  { %v2389_v12 = vsel %vm290_vm2, %v2385_v6, -inf  ;;  %v2384_v25 = vadd.f32 %v3706_v24, %v2382_v2 }
0x13bf   :  { %2390 = vmax.xlane.f32.xlu1 %v2389_v12  ;;  %v3524_v12 = vpop.f32.mrf.mxu1 }
0x13c0   :  { %v2386_v13 = vsel %vm290_vm2, %v2384_v25, -inf }
0x13c1   :  { %2387 = vmax.xlane.f32.xlu0 %v2386_v13  ;;  %v3550_v14 = vpop.f32.mrf.mxu0 }
0x13c2   :  { %v2670_v42 = vmul.f32 0.35355338, %v3550_v14 }
0x13c3   :  { %v2660_v26 = vpop.f32.mrf.mxu0 }
0x13c4   :  { %v2669_v8 = vmul.f32 0.35355338, %v2660_v26  ;;  %v2672_v46 = vadd.f32 %v3705_v5, %v2670_v42 }
0x13c6   :  { %v2671_v18 = vadd.f32 %v3706_v24, %v2669_v8  ;;  %v2676_v48 = vsel %vm290_vm2, %v2672_v46, -inf  ;;  %v2282_v24 = vpop.f32.mrf.mxu1 }
0x13c8   :  { %v2673_v21 = vsel %vm290_vm2, %v2671_v18, -inf }
0x13d0   :  { %2410 = vrot.lane.b32.xlu1 %v4235_v63, %s3786_s28 }
0x13f4   :  { %2674 = vmax.xlane.f32.xlu1 %v2673_v21  ;;  %v2288_v21 = vadd.f32 %v3524_v12, %v4334_v56 }
0x1448   :  { %v2391_v17 = vpop.xlane.xlu1 %2390 }
0x1449   :  { %v2393_v27 = vsub.f32 %v2385_v6, %v2391_v17 }
0x144a   :  { %v2388_v28 = vpop.xlane.xlu0 %2387 }
0x144b   :  { %v2396_v29 = vmul.f32 1.442695, %v2393_v27  ;;  %v2392_v30 = vsub.f32 %v2384_v25, %v2388_v28  ;;  %v2283_v27 = vadd.f32 %v2282_v24, %v4336_v59 }
0x144c   :  { %v2411_v31 = vpop.permute.xlu1 %2410 }
0x144d   :  { %3673 = vpow2.f32 %v2396_v29  ;;  %v2394_v32 = vmul.f32 1.442695, %v2392_v30  ;;  %3532 = vmatprep.subr.mxu1 %v2411_v31 }
0x144e   :  { %3533 = vmatpush3.msra.mxu1 %v2411_v31 }
0x144f   :  { %3675 = vpow2.f32 %v2394_v32 }
0x145a   :  { %v3674_v33 = vpop.eup %3673 }
0x145b   :  { %v2401_v34 = vsel %vm290_vm2, %v3674_v33, 0.0 }
0x145c   :  { %v3676_v36 = vpop.eup %3675  ;;  %2402 = vadd.xlane.f32.xlu0 %v2401_v34 }
0x145d   :  { %v2398_v38 = vsel %vm290_vm2, %v3676_v36, 0.0 }
0x1460   :  { %2399 = vadd.xlane.f32.xlu0 %v2398_v38 }
0x1476   :  { %2408 = vrot.lane.b32.xlu0 %v4238_v9, %s3786_s28 }
0x147d   :  { %v2675_v39 = vpop.xlane.xlu1 %2674 }
0x147e   :  { %v2679_v40 = vsub.f32 %v2671_v18, %v2675_v39 }
0x1480   :  { %v2681_v41 = vmul.f32 1.442695, %v2679_v40 }
0x1482   :  { %3677 = vpow2.f32 %v2681_v41 }
0x148f   :  { %v3678_v44 = vpop.eup %3677 }
0x1490   :  { %v2685_v45 = vsel %vm290_vm2, %v3678_v44, 0.0 }
0x1491   :  { %2686 = vadd.xlane.f32.xlu1 %v2685_v45 }
0x1495   :  { %2677 = vmax.xlane.f32.xlu0 %v2676_v48 }
0x14a2   :  { %2697 = vrot.lane.b32.xlu1 %v4235_v63, %s3787_s29 }
0x14e5   :  { %v2403_v50 = vpop.xlane.xlu0 %2402 }
0x14e6   :  { %3679 = vrcp.f32 %v2403_v50 }
0x14e9   :  { %v2400_v51 = vpop.xlane.xlu0 %2399 }
0x14ea   :  { %3681 = vrcp.f32 %v2400_v51 }
0x14ed   :  { %v2409_v53 = vpop.permute.xlu0 %2408 }
0x14ee   :  { %3534 = vmatprep.subr.mxu1 %v2409_v53 }
0x14ef   :  { %3535 = vmatpush3.msra.mxu1 %v2409_v53 }
0x14f0   :  { %3539 = vmatprep.subr.mxu1 %v4047_v22 }
0x14f3   :  { %v3680_v35 = vpop.eup %3679 }
0x14f4   :  { %v2407_v55 = vmul.f32 %v3680_v35, %v3674_v33 }
0x14f7   :  { %v3682_v16 = vpop.eup %3681 }
0x14f8   :  { %v2406_v37 = vmul.f32 %v3682_v16, %v3676_v36 }
0x14fa   :  { %3536 = vmatprep.mubr.msk.f32.mxu1 %vm290_vm2, %v2406_v37 }
0x14fb   :  { %3537 = vmatmul.mubr.msk.f32.vlgmr.msra.gmra.mxu1 %vm290_vm2, %v2407_v55 }
0x14fc   :  { %3540 = vmatpush3.msra.mxu1 %v4047_v22 }
0x151a   :  { %v2687_v63 = vpop.xlane.xlu1 %2686 }
0x151e   :  { %v2698_v62 = vpop.permute.xlu1 %2697  ;;  %v2678_v7 = vpop.xlane.xlu0 %2677 }
0x151f   :  { %v2680_v11 = vsub.f32 %v2672_v46, %v2678_v7  ;;  %3551 = vmatprep.subr.mxu1 %v2698_v62 }
0x1521   :  { %v2683_v2 = vmul.f32 1.442695, %v2680_v11 }
0x1523   :  { %3683 = vpow2.f32 %v2683_v2 }
0x1524   :  { %3685 = vrcp.f32 %v2687_v63 }
0x1530   :  { %v3684_v5 = vpop.eup %3683 }
0x1531   :  { %v2688_v6 = vsel %vm290_vm2, %v3684_v5, 0.0  ;;  %v3686_v25 = vpop.eup %3685 }
0x1532   :  { %2689 = vadd.xlane.f32.xlu0 %v2688_v6  ;;  %v2693_v26 = vmul.f32 %v3686_v25, %v3678_v44 }
0x1548   :  { %2695 = vrot.lane.b32.xlu0 %v4238_v9, %s3787_s29 }
0x15bb   :  { %v3538_v13 = vpop.f32.mrf.mxu1  ;;  %v2690_v22 = vpop.xlane.xlu0 %2689 }
0x15bc   :  { %3687 = vrcp.f32 %v2690_v22 }
0x15bd   :  { %v2486_v14 = vpop.f32.mrf.mxu1 }
0x15be   :  { %3541 = vmatprep.mubr.msk.f32.mxu1 %vm202_vm1, %v2486_v14 }
0x15bf   :  { %3542 = vmatmul.mubr.msk.f32.vlgmr.msra.gmra.mxu1 %vm202_vm1, %v3538_v13  ;;  %v2696_v8 = vpop.permute.xlu0 %2695 }
0x15c0   :  { %3552 = vmatpush3.msra.mxu1 %v2698_v62  ;;  %3555 = vmatprep.mubr.msk.f32.mxu1 %vm290_vm2, %v2693_v26 }
0x15c1   :  { %3553 = vmatprep.subr.mxu1 %v2696_v8 }
0x15c2   :  { %3554 = vmatpush3.msra.mxu1 %v2696_v8 }
0x15c3   :  { %3558 = vmatprep.subr.mxu1 %v4063_v10 }
0x15c9   :  { %v3688_v9 = vpop.eup %3687 }
0x15ca   :  { %v2694_v18 = vmul.f32 %v3688_v9, %v3684_v5 }
0x15cc   :  { %3556 = vmatmul.mubr.msk.f32.vlgmr.msra.gmra.mxu1 %vm290_vm2, %v2694_v18 }
0x15cd   :  { %3559 = vmatpush3.msra.mxu1 %v4063_v10 }
0x15ce   :  { %3574 = vmatprep.subr.mxu1 %v4116_v15 }
0x167f   :  { %v3543_v17 = vpop.f32.mrf.mxu1 }
0x1680   :  { %v2577_v28 = vadd.f32 %v3543_v17, %v2288_v21 }
0x1681   :  { %v2567_v29 = vpop.f32.mrf.mxu1 }
0x1682   :  { %v2576_v30 = vadd.f32 %v2567_v29, %v2283_v27 }
0x168c   :  { %v3557_v31 = vpop.f32.mrf.mxu1 }
0x168e   :  { %v2773_v32 = vpop.f32.mrf.mxu1 }
0x168f   :  { %3560 = vmatprep.mubr.msk.f32.mxu1 %vm202_vm1, %v2773_v32 }
0x1690   :  { %3561 = vmatmul.mubr.msk.f32.vlgmr.msra.gmra.mxu1 %vm202_vm1, %v3557_v31 }
0x1691   :  { %3575 = vmatpush3.msra.mxu1 %v4116_v15 }
0x1692   :  { %3576 = vmatprep.subr.mxu1 %v4121_v19 }
0x1693   :  { %3577 = vmatpush3.msra.mxu1 %v4121_v19 }
0x1694   :  { %3578 = vmatprep.subr.mxu1 %v4128_v20 }
0x1695   :  { %3579 = vmatpush3.msra.mxu1 %v4128_v20 }
0x1696   :  { %3580 = vmatprep.subr.mxu1 %v4135_v23 }
0x1697   :  { %3581 = vmatpush3.msra.mxu1 %v4135_v23 }
0x1698   :  { %3582 = vmatprep.subr.mxu1 %v4167_v52 }
0x1699   :  { %3583 = vmatpush3.msra.mxu1 %v4167_v52 }
0x169a   :  { %3584 = vmatprep.subr.mxu1 %v4174_v0 }
0x169b   :  { %3585 = vmatpush3.msra.mxu1 %v4174_v0 }
0x169c   :  { %3586 = vmatprep.subr.mxu1 %v4181_v1 }
0x169d   :  { %3587 = vmatpush3.msra.mxu1 %v4181_v1 }
0x169e   :  { %3588 = vmatprep.subr.mxu1 %v4188_v3 }
0x169f   :  { %3589 = vmatpush3.msra.mxu1 %v4188_v3 }
0x1750   :  { %v3562_v10 = vpop.f32.mrf.mxu1 }
0x1751   :  { %v2864_v15 = vadd.f32 %v3562_v10, %v2577_v28 }
0x1752   :  { %v2854_v19 = vpop.f32.mrf.mxu1 }
0x1753   :  { %v2866_v20 = vadd.f32 %v4074_v49, %v2864_v15  ;;  %v2863_v23 = vadd.f32 %v2854_v19, %v2576_v30 }
0x1755   :  { %v2865_v52 = vadd.f32 %v4074_v49, %v2863_v23  ;;  %v2868_v56 = vadd.f32 %v2866_v20, %v4228_v61 }
0x1757   :  { %v2872_v0 = vsel %vm114_vm0, %v2868_v56, 0.0  ;;  %v2867_v59 = vadd.f32 %v2865_v52, %v4225_v60 }
0x1758   :  { %2873 = vadd.xlane.f32.xlu0 %v2872_v0 }
0x1759   :  { %v2869_v1 = vsel %vm114_vm0, %v2867_v59, 0.0 }
0x175a   :  { %2870 = vadd.xlane.f32.xlu1 %v2869_v1 }
0x17e1   :  { %v2874_v33 = vpop.xlane.xlu0 %2873 }
0x17e2   :  { %v2876_v3 = vmul.f32 0.03125, %v2874_v33 }
0x17e3   :  { %v2871_v34 = vpop.xlane.xlu1 %2870 }
0x17e4   :  { %v2878_v36 = vsub.f32 %v2868_v56, %v2876_v3  ;;  %v2875_v38 = vmul.f32 0.03125, %v2871_v34 }
0x17e6   :  { %v2877_v39 = vsub.f32 %v2867_v59, %v2875_v38  ;;  %v2880_v40 = vmul.f32 %v2878_v36, %v2878_v36 }
0x17e8   :  { %v2884_v41 = vsel %vm114_vm0, %v2880_v40, 0.0  ;;  %v2879_v49 = vmul.f32 %v2877_v39, %v2877_v39 }
0x17e9   :  { %2885 = vadd.xlane.f32.xlu0 %v2884_v41 }
0x17ea   :  { %v2881_v61 = vsel %vm114_vm0, %v2879_v49, 0.0 }
0x17eb   :  { %2882 = vadd.xlane.f32.xlu1 %v2881_v61 }
0x1872   :  { %v2886_v42 = vpop.xlane.xlu0 %2885 }
0x1873   :  { %v2888_v60 = vmul.f32 0.03125, %v2886_v42 }
0x1874   :  { %v2883_v44 = vpop.xlane.xlu1 %2882 }
0x1875   :  { %v2890_v45 = vadd.f32 1e-05, %v2888_v60  ;;  %v2887_v46 = vmul.f32 0.03125, %v2883_v44 }
0x1877   :  { %3689 = vrsqrt.f32 %v2890_v45  ;;  %v2889_v48 = vadd.f32 1e-05, %v2887_v46  ;;  %vm2900_vm12 = vcmp.eq.f32.partialorder %v2890_v45, inf  ;;  %v2903_v53 = vand.u32 2147483648, %v2890_v45 }
0x1878   :  { %vm2902_vm13 = vcmp.eq.f32.partialorder %v2890_v45, 0.0 }
0x1879   :  { %3691 = vrsqrt.f32 %v2889_v48  ;;  %vm2893_vm14 = vcmp.eq.f32.partialorder %v2889_v48, inf  ;;  %v2896_v63 = vand.u32 2147483648, %v2889_v48  ;;  %vm2895_vm15 = vcmp.eq.f32.partialorder %v2889_v48, 0.0 }
0x1884   :  { %v3690_v50 = vpop.eup %3689 }
0x1885   :  { %v2899_v51 = vmul.f32 %v3690_v50, %v2890_v45 }
0x1886   :  { %v3692_v35 = vpop.eup %3691 }
0x1887   :  { %v2901_v16 = vsel %vm2900_vm12, %v2890_v45, %v2899_v51  ;;  %v2892_v55 = vmul.f32 %v3692_v35, %v2889_v48 }
0x1888   :  { %v2904_v37 = vsel %vm2902_vm13, %v2903_v53, %v2901_v16 }
0x1889   :  { %3693 = vrcp.f32 %v2904_v37  ;;  %v2894_v62 = vsel %vm2893_vm14, %v2889_v48, %v2892_v55 }
0x188a   :  { %v2897_v7 = vsel %vm2895_vm15, %v2896_v63, %v2894_v62 }
0x188b   :  { %3695 = vrcp.f32 %v2897_v7 }
0x1896   :  { %v3694_v11 = vpop.eup %3693 }
0x1897   :  { %v2908_v2 = vmul.f32 %v3694_v11, %v2878_v36 }
0x1898   :  { %v3696_v5 = vpop.eup %3695 }
0x1899   :  { %v2906_v6 = vmul.f32 %v3696_v5, %v2877_v39  ;;  %v2910_v12 = vmul.f32 %v4144_v43, %v2908_v2 }
0x189b   :  { %v2909_v24 = vmul.f32 %v4144_v43, %v2906_v6  ;;  %v2912_v13 = vadd.f32 %v4150_v47, %v2910_v12 }
0x189d   :  { %v2911_v25 = vadd.f32 %v4150_v47, %v2909_v24 }
0x189f   :  { %3571 = vmatprep.mubr.msk.f32.mxu0 %vm114_vm0, %v2911_v25 }
0x18a0   :  { %3572 = vmatmul.mubr.msk.f32.vlgmr.msra.gmra.mxu0 %vm114_vm0, %v2912_v13 }
0x1960   :  { %v3573_v22 = vpop.f32.mrf.mxu0 }
0x1961   :  { %v2991_v14 = vadd.f32 %v3573_v22, %v4195_v4 }
0x1962   :  { %v2985_v26 = vpop.f32.mrf.mxu0 }
0x1963   :  { %v2986_v8 = vadd.f32 %v4195_v4, %v2985_v26  ;;  %v2995_v18 = vmax.f32 %v2991_v14, 0.0 }
0x1965   :  { %v2994_v9 = vmax.f32 %v2986_v8, 0.0 }
0x1967   :  { %3590 = vmatprep.mubr.msk.f32.mxu1 %vm1502_vm7, %v2994_v9 }
0x1968   :  { %3591 = vmatmul.mubr.msk.f32.vlgmr.msra.gmra.mxu1 %vm1502_vm7, %v2995_v18 }
0x1a28   :  { %v3592_v43 = vpop.f32.mrf.mxu1 }
0x1a29   :  { %v3074_v21 = vadd.f32 %v3592_v43, %v4204_v57 }
0x1a2a   :  { %v3068_v47 = vpop.f32.mrf.mxu1 }
0x1a2b   :  { %v3069_v17 = vadd.f32 %v4204_v57, %v3068_v47  ;;  %v3078_v27 = vadd.f32 %v3074_v21, %v2912_v13 }
0x1a2d   :  { %v3082_v28 = vsel %vm114_vm0, %v3078_v27, 0.0  ;;  %v3077_v29 = vadd.f32 %v3069_v17, %v2911_v25 }
0x1a2e   :  { %3083 = vadd.xlane.f32.xlu0 %v3082_v28 }
0x1a2f   :  { %v3079_v30 = vsel %vm114_vm0, %v3077_v29, 0.0 }
0x1a30   :  { %3080 = vadd.xlane.f32.xlu1 %v3079_v30 }
0x1ab7   :  { %v3084_v4 = vpop.xlane.xlu0 %3083 }
0x1ab8   :  { %v3086_v31 = vmul.f32 0.03125, %v3084_v4 }
0x1ab9   :  { %v3081_v32 = vpop.xlane.xlu1 %3080 }
0x1aba   :  { %v3088_v10 = vsub.f32 %v3078_v27, %v3086_v31  ;;  %v3085_v15 = vmul.f32 0.03125, %v3081_v32 }
0x1abc   :  { %v3087_v19 = vsub.f32 %v3077_v29, %v3085_v15  ;;  %v3090_v20 = vmul.f32 %v3088_v10, %v3088_v10 }
0x1abe   :  { %v3094_v23 = vsel %vm114_vm0, %v3090_v20, 0.0  ;;  %v3089_v52 = vmul.f32 %v3087_v19, %v3087_v19 }
0x1abf   :  { %3095 = vadd.xlane.f32.xlu0 %v3094_v23 }
0x1ac0   :  { %v3091_v57 = vsel %vm114_vm0, %v3089_v52, 0.0 }
0x1ac1   :  { %3092 = vadd.xlane.f32.xlu1 %v3091_v57 }
0x1b48   :  { %v3096_v56 = vpop.xlane.xlu0 %3095 }
0x1b49   :  { %v3098_v0 = vmul.f32 0.03125, %v3096_v56 }
0x1b4a   :  { %v3093_v59 = vpop.xlane.xlu1 %3092 }
0x1b4b   :  { %v3100_v1 = vadd.f32 1e-05, %v3098_v0  ;;  %v3097_v33 = vmul.f32 0.03125, %v3093_v59 }
0x1b4d   :  { %3697 = vrsqrt.f32 %v3100_v1  ;;  %v3099_v3 = vadd.f32 1e-05, %v3097_v33  ;;  %vm3110_vm1 = vcmp.eq.f32.partialorder %v3100_v1, inf  ;;  %v3113_v38 = vand.u32 2147483648, %v3100_v1 }
0x1b4e   :  { %vm3112_vm2 = vcmp.eq.f32.partialorder %v3100_v1, 0.0 }
0x1b4f   :  { %3699 = vrsqrt.f32 %v3099_v3  ;;  %vm3103_vm3 = vcmp.eq.f32.partialorder %v3099_v3, inf  ;;  %v3106_v61 = vand.u32 2147483648, %v3099_v3  ;;  %vm3105_vm4 = vcmp.eq.f32.partialorder %v3099_v3, 0.0 }
0x1b5a   :  { %v3698_v34 = vpop.eup %3697 }
0x1b5b   :  { %v3109_v36 = vmul.f32 %v3698_v34, %v3100_v1 }
0x1b5c   :  { %v3700_v39 = vpop.eup %3699 }
0x1b5d   :  { %v3111_v40 = vsel %vm3110_vm1, %v3100_v1, %v3109_v36  ;;  %v3102_v49 = vmul.f32 %v3700_v39, %v3099_v3 }
0x1b5e   :  { %v3114_v41 = vsel %vm3112_vm2, %v3113_v38, %v3111_v40 }
0x1b5f   :  { %3701 = vrcp.f32 %v3114_v41  ;;  %v3104_v42 = vsel %vm3103_vm3, %v3099_v3, %v3102_v49 }
0x1b60   :  { %v3107_v60 = vsel %vm3105_vm4, %v3106_v61, %v3104_v42 }
0x1b61   :  { %3703 = vrcp.f32 %v3107_v60 }
0x1b6c   :  { %v3702_v44 = vpop.eup %3701 }
0x1b6d   :  { %v3118_v45 = vmul.f32 %v3702_v44, %v3088_v10 }
0x1b6e   :  { %v3704_v46 = vpop.eup %3703 }
0x1b6f   :  { %v3120_v48 = vmul.f32 %v4215_v54, %v3118_v45  ;;  %v3116_v50 = vmul.f32 %v3704_v46, %v3087_v19 }
0x1b71   :  { %v3122_v51 = vadd.f32 %v4221_v58, %v3120_v48  ;;  %v3119_v53 = vmul.f32 %v4215_v54, %v3116_v50 }
0x1b73   :  { %3124 = vst.msk [vmem:[#allocation7 + $0x8] sm:$0xff] %vm114_vm0, %v3122_v51  ;;  %v3121_v35 = vadd.f32 %v4221_v58, %v3119_v53 }
0x1b75   :  { %3123 = vst.msk [vmem:[#allocation7] sm:$0xff] %vm114_vm0, %v3121_v35 }
0x1b76   :  { %3758 = shalt.err (!%p3755_p0)
}
0x1b77   :  { %3136 = dma.vmem_to_hbm [thread:$0]  %s3131_s13, 256, %s4434_s14, [#allocation4], %s3774_s16, %s3774_s16, %s3775_s17  }
0x1b78   :  { %3771 = dma.done.wait [#allocation4], 256  }
0x1b79   :  { %3772 = vsyncadd [#allocation4], 4294967040 }
0x1b7a   :  { %3140 = vsyncpa [#allocation3], 1 }
0x1b7b   :  { %3141 = vsyncpa [#allocation6], 1 }
0x1b7c   :  { %3142 = vsyncpa [#allocation4], 1 }

</bundles_post_ra>
